<compile_context>
chip_gen: v6e
topology: v6e:2x2x1
jax: 0.10.0
libtpu: 0.0.40
codegen_flags: <defaults>
</compile_context>

<pallas_src>
import functools

import jax
import jax.numpy as jnp
from jax import lax
from jax.experimental import pallas as pl
from jax.experimental.pallas import tpu as pltpu


def _tree_kernel(x_ref, m_ref, w1a_r, w2a_r, w3a_r, w1b_r, w2b_r, w3b_r,
                 wra_r, wrb_r, bias_r, o_ref, *scratch,
                 W, dilation, compute_dtype, im2col):
    """One image per grid step, channels-first (C, HWp) layout.

    x_ref  : (1, C, HWp)   f32 activations (lane axis padded to 128k)
    m_ref  : (9, HWp)      f32 0/1 validity mask per 3x3 tap offset
    w1*    : (Cb, C)       1x1 conv, BN scale pre-folded      (compute dtype)
    w2*    : (Cb, 9*Cb)    3x3 conv (im2col layout), folded   (compute dtype)
    w3*    : (C, Cb)       1x1 conv, folded                   (compute dtype)
    wra/b  : (C, C)        root 1x1 conv split for x2 / x1    (compute dtype)
    bias_r : (C, 8)        packed f32 biases [b1a b2a b3a b1b b2b b3b br -]
    o_ref  : (1, C, HWp)
    scratch: optional (9*Cb, HWp) im2col buffer (compute dtype)
    """
    d = dilation
    cdt = compute_dtype
    cb = w1a_r.shape[0]
    hw = x_ref.shape[2]

    x_f = x_ref[0].astype(jnp.float32)            # (C, HWp)
    masks = m_ref[...]                            # (9, HWp) f32
    bias = bias_r[...]                            # (C, 8)   f32

    b1a = bias[:cb, 0:1]; b2a = bias[:cb, 1:2]; b3a = bias[:, 2:3]
    b1b = bias[:cb, 3:4]; b2b = bias[:cb, 4:5]; b3b = bias[:, 5:6]
    br = bias[:, 6:7]

    offsets = [(dy, dx) for dy in (-d, 0, d) for dx in (-d, 0, d)]

    def tap_k(t_f32, k, dy, dx):
        # result[:, i] = t[:, i + dy*W + dx]; circular wrap + row/col OOB lanes
        # are zeroed by the precomputed mask (cheap XLU rotate, no copies).
        s = dy * W + dx
        if s == 0:
            return t_f32
        t = pltpu.roll(t_f32, shift=(-s) % hw, axis=1)
        return t * masks[k:k + 1, :]

    def conv3x3(t_f32, w2_r):
        if im2col:
            # Write taps directly into the VMEM scratch, single fused dot
            # (deep K = 9*Cb contraction; best on v5e/v6e's MRF result path).
            buf = scratch[0]
            for k, (dy, dx) in enumerate(offsets):
                buf[k * cb:(k + 1) * cb, :] = tap_k(t_f32, k, dy, dx).astype(cdt)
            return jnp.dot(w2_r[...], buf[...],
                           preferred_element_type=jnp.float32)
        # Per-tap accumulating dots: no im2col buffer at all (VMEM-lean,
        # best on v7x where the MRB accumulates matmul results in place).
        acc = jnp.zeros((cb, hw), jnp.float32)
        for k, (dy, dx) in enumerate(offsets):
            acc = acc + jnp.dot(w2_r[:, k * cb:(k + 1) * cb],
                                tap_k(t_f32, k, dy, dx).astype(cdt),
                                preferred_element_type=jnp.float32)
        return acc

    def block(inp_f, inp_c, w1_r, w2_r, w3_r, b1, b2, b3):
        # DLA Bottleneck with residual = inp (Cin == Cout, stride == 1).
        # BN scales already folded into the weights -> only bias + ReLU here.
        t1 = jnp.dot(w1_r[...], inp_c, preferred_element_type=jnp.float32)
        t1 = jnp.maximum(t1 + b1, 0.0)
        t2 = jnp.maximum(conv3x3(t1, w2_r) + b2, 0.0)
        t3 = jnp.dot(w3_r[...], t2.astype(cdt),
                     preferred_element_type=jnp.float32)
        return jnp.maximum(t3 + b3 + inp_f, 0.0)

    x_c = x_f.astype(cdt)
    x1 = block(x_f, x_c, w1a_r, w2a_r, w3a_r, b1a, b2a, b3a)
    x1_c = x1.astype(cdt)                         # reused by block b AND root
    x2 = block(x1, x1_c, w1b_r, w2b_r, w3b_r, b1b, b2b, b3b)
    x2_c = x2.astype(cdt)

    # Root: ReLU(BN(Conv1x1(cat([x2, x1])))) == two accumulating dots
    # (no 2C x HW concat materialization), root_residual=False.
    r = (jnp.dot(wra_r[...], x2_c, preferred_element_type=jnp.float32)
         + jnp.dot(wrb_r[...], x1_c, preferred_element_type=jnp.float32)
         + br)
    o_ref[0] = jnp.maximum(r, 0.0).astype(o_ref.dtype)


def tree_forward(x_nchw, params, *, dilation=1, compute_dtype=jnp.bfloat16,
                 im2col=True):
    """Tree forward (levels=1, stride=1). x_nchw: (N, C, H, W) float32.

    im2col=True : taps staged in one VMEM scratch + single fused dot (v5e/v6e).
    im2col=False: 9 accumulating dots, no scratch (VMEM-lean; best on v7x).
    """
    blk_a, blk_b, (wr, sr, br) = params
    N, C, H, W = x_nchw.shape
    HW = H * W
    HWp = -(-HW // 128) * 128                    # lane axis padded to 128k
    d = dilation
    cdt = compute_dtype
    cb = blk_a[1].shape[0]

    assert blk_a[0].shape[1] == C, "in_channels must equal out_channels"
    assert wr.shape == (C, 2 * C), "root expects root_dim == 2*out_channels"

    # Free reshape: keep NCHW, flatten spatial; zero-pad the lane axis.
    x2d = x_nchw.reshape(N, C, HW)
    if HWp != HW:
        x2d = jnp.pad(x2d, ((0, 0), (0, 0), (0, HWp - HW)))

    # 3x3 tap validity masks (zero at row/col OOB; padded lanes also zero,
    # so circular-roll wrap positions never contribute).
    yy = jnp.arange(H).reshape(H, 1)
    xx = jnp.arange(W).reshape(1, W)
    mask_list = []
    for dy in (-d, 0, d):
        for dx in (-d, 0, d):
            valid = ((yy + dy >= 0) & (yy + dy < H) &
                     (xx + dx >= 0) & (xx + dx < W))
            mask_list.append(valid.reshape(HW))
    masks = jnp.stack(mask_list, axis=0).astype(jnp.float32)
    if HWp != HW:
        masks = jnp.pad(masks, ((0, 0), (0, HWp - HW)))

    def prep_block(p):
        # Fold the eval-mode BN scale into the conv weights (f32, then cast).
        w1, w2, w3, s1, b1, s2, b2, s3, b3 = p
        o, i = w2.shape[0], w2.shape[1]
        # OIHW -> (O, kH, kW, I) -> (O, 9*I), matching the tap ordering above.
        w2r = jnp.transpose(w2, (0, 2, 3, 1)).reshape(o, 9 * i)
        return ((w1 * s1[:, None]).astype(cdt),
                (w2r * s2[:, None]).astype(cdt),
                (w3 * s3[:, None]).astype(cdt),
                b1, b2, b3)

    w1a, w2a, w3a, b1a, b2a, b3a = prep_block(blk_a)
    w1b, w2b, w3b, b1b, b2b, b3b = prep_block(blk_b)

    wrf = wr * sr[:, None]                       # fold root BN scale (f32)
    wra = wrf[:, :C].astype(cdt)                 # multiplies x2
    wrb = wrf[:, C:].astype(cdt)                 # multiplies x1

    def pad_c(v):
        return jnp.pad(v, (0, C - v.shape[0])) if v.shape[0] < C else v

    bias_pack = jnp.stack(
        [pad_c(b1a), pad_c(b2a), b3a, pad_c(b1b), pad_c(b2b), b3b,
         br, jnp.zeros((C,), jnp.float32)], axis=1)          # (C, 8) f32

    args = (x2d, masks, w1a, w2a, w3a, w1b, w2b, w3b, wra, wrb, bias_pack)

    in_specs = [pl.BlockSpec((1, C, HWp), lambda n: (n, 0, 0))]
    in_specs += [pl.BlockSpec(a.shape, lambda n: (0, 0)) for a in args[1:]]

    scratch_shapes = [pltpu.VMEM((9 * cb, HWp), cdt)] if im2col else []

    # Scoped-VMEM budget from the actual working set (+headroom); the default
    # scoped limit (16/32 MiB) is far below physical VMEM.
    itemsize = jnp.dtype(cdt).itemsize
    act_f32 = C * HWp * 4
    est = (4 * act_f32                           # in/out double buffers
           + (9 * cb * HWp * itemsize if im2col else 0)
           + 10 * act_f32)                       # live f32 intermediates
    vmem_limit = int(min(max(2 * est, 32 << 20), 96 << 20))

    kernel = functools.partial(_tree_kernel, W=W, dilation=d,
                               compute_dtype=cdt, im2col=im2col)

    out2d = pl.pallas_call(
        kernel,
        out_shape=jax.ShapeDtypeStruct((N, C, HWp), x_nchw.dtype),
        grid_spec=pltpu.PrefetchScalarGridSpec(
            num_scalar_prefetch=0,
            grid=(N,),
            in_specs=in_specs,
            out_specs=pl.BlockSpec((1, C, HWp), lambda n: (n, 0, 0)),
            scratch_shapes=scratch_shapes,
        ),
        compiler_params=pltpu.CompilerParams(
            dimension_semantics=("parallel",),
            vmem_limit_bytes=vmem_limit),
    )(*args)

    return out2d[:, :, :HW].reshape(N, C, H, W)


def make_tree_params(key, channels):
    """Deterministic synthetic params (conv weights + folded eval-mode BN)."""
    expansion = 2
    cb = channels // expansion
    keys = jax.random.split(key, 4)
    eps = 1e-5

    def bn_fold(k, c):
        kg, kb, km, kv = jax.random.split(k, 4)
        gamma = 1.0 + 0.1 * jax.random.normal(kg, (c,), jnp.float32)
        beta = 0.1 * jax.random.normal(kb, (c,), jnp.float32)
        mean = 0.1 * jax.random.normal(km, (c,), jnp.float32)
        var = jnp.abs(jax.random.normal(kv, (c,), jnp.float32)) + 0.5
        scale = gamma / jnp.sqrt(var + eps)
        bias = beta - mean * scale
        return scale, bias

    def make_block(k, cin, cout):
        k1, k2, k3, kb1, kb2, kb3 = jax.random.split(k, 6)
        w1 = 0.1 * jax.random.normal(k1, (cb, cin), jnp.float32)        # 1x1 (O, I)
        w2 = 0.1 * jax.random.normal(k2, (cb, cb, 3, 3), jnp.float32)   # OIHW
        w3 = 0.1 * jax.random.normal(k3, (cout, cb), jnp.float32)       # 1x1 (O, I)
        s1, b1 = bn_fold(kb1, cb)
        s2, b2 = bn_fold(kb2, cb)
        s3, b3 = bn_fold(kb3, cout)
        return (w1, w2, w3, s1, b1, s2, b2, s3, b3)

    blk_a = make_block(keys[0], channels, channels)
    blk_b = make_block(keys[1], channels, channels)
    wr = 0.1 * jax.random.normal(keys[2], (channels, 2 * channels), jnp.float32)
    sr, br = bn_fold(keys[3], channels)
    return (blk_a, blk_b, (wr, sr, br))


def reference_forward(x, params, *, dilation=1):
    """Plain-JAX reference (lax.conv, NCHW/OIHW) for correctness checking."""
    blk_a, blk_b, (wr, sr, br) = params
    dn = ('NCHW', 'OIHW', 'NCHW')

    def bn(y, s, b):
        return y * s[None, :, None, None] + b[None, :, None, None]

    def block_ref(inp, residual, p):
        w1, w2, w3, s1, b1, s2, b2, s3, b3 = p
        y = lax.conv_general_dilated(inp, w1[:, :, None, None], (1, 1), 'VALID',
                                     dimension_numbers=dn)
        y = jnp.maximum(bn(y, s1, b1), 0.0)
        y = lax.conv_general_dilated(y, w2, (1, 1),
                                     [(dilation, dilation), (dilation, dilation)],
                                     rhs_dilation=(dilation, dilation),
                                     dimension_numbers=dn)
        y = jnp.maximum(bn(y, s2, b2), 0.0)
        y = lax.conv_general_dilated(y, w3[:, :, None, None], (1, 1), 'VALID',
                                     dimension_numbers=dn)
        y = bn(y, s3, b3)
        return jnp.maximum(y + residual, 0.0)

    x1 = block_ref(x, x, blk_a)
    x2 = block_ref(x1, x1, blk_b)
    y = lax.conv_general_dilated(jnp.concatenate([x2, x1], axis=1),
                                 wr[:, :, None, None], (1, 1), 'VALID',
                                 dimension_numbers=dn)
    return jnp.maximum(bn(y, sr, br), 0.0)


if __name__ == "__main__":
    key = jax.random.PRNGKey(0)
    kx, kp, kx2 = jax.random.split(key, 3)

    N, C, H, W = 2, 32, 16, 16              # channels=32 -> bottle_planes=16
    x = jax.random.normal(kx, (N, C, H, W), jnp.float32)
    params = make_tree_params(kp, channels=C)

    ref = reference_forward(x, params, dilation=1)

    # f32 matmul path (same math as the reference), fused-im2col variant.
    out_f32 = jax.block_until_ready(
        tree_forward(x, params, dilation=1, compute_dtype=jnp.float32,
                     im2col=True))
    assert out_f32.shape == (N, C, H, W)
    assert jnp.allclose(out_f32, ref, atol=1e-3, rtol=1e-3), "f32 mismatch"

    # bf16-MXU path (f32 accumulation), fused-im2col variant (v5e/v6e).
    out_bf16 = jax.block_until_ready(
        tree_forward(x, params, dilation=1, compute_dtype=jnp.bfloat16,
                     im2col=True))
    assert out_bf16.shape == (N, C, H, W)
    assert jnp.allclose(out_bf16, ref, atol=5e-2, rtol=5e-2), "bf16 mismatch"

    # bf16 per-tap accumulation variant (no im2col scratch; v7x-friendly).
    out_acc = jax.block_until_ready(
        tree_forward(x, params, dilation=1, compute_dtype=jnp.bfloat16,
                     im2col=False))
    assert jnp.allclose(out_acc, ref, atol=5e-2, rtol=5e-2), "per-tap mismatch"

    # Non-128-multiple spatial size + dilation=2 (exercises lane padding,
    # circular-roll masking and dilated taps).
    H2, W2 = 10, 10
    x2 = jax.random.normal(kx2, (N, C, H2, W2), jnp.float32)
    ref2 = reference_forward(x2, params, dilation=2)
    out2 = jax.block_until_ready(
        tree_forward(x2, params, dilation=2, compute_dtype=jnp.float32,
                     im2col=True))
    assert jnp.allclose(out2, ref2, atol=1e-3, rtol=1e-3), "dilated mismatch"

    print("KERNEL_OK")
</pallas_src>

<mosaic_0001>
module attributes {stable_mosaic.version = 11 : i64} {
  func.func @_tree_kernel(%arg0: i32, %arg1: memref<1x32x256xf32, #tpu.memory_space<vmem>>, %arg2: memref<9x256xf32, #tpu.memory_space<vmem>>, %arg3: memref<16x32xf32, #tpu.memory_space<vmem>>, %arg4: memref<16x144xf32, #tpu.memory_space<vmem>>, %arg5: memref<32x16xf32, #tpu.memory_space<vmem>>, %arg6: memref<16x32xf32, #tpu.memory_space<vmem>>, %arg7: memref<16x144xf32, #tpu.memory_space<vmem>>, %arg8: memref<32x16xf32, #tpu.memory_space<vmem>>, %arg9: memref<32x32xf32, #tpu.memory_space<vmem>>, %arg10: memref<32x32xf32, #tpu.memory_space<vmem>>, %arg11: memref<32x8xf32, #tpu.memory_space<vmem>>, %arg12: memref<1x32x256xf32, #tpu.memory_space<vmem>>, %arg13: memref<144x256xf32, #tpu.memory_space<vmem>>) attributes {dimension_semantics = [#tpu.dimension_semantics<parallel>], iteration_bounds = array<i64: 2>, scalar_prefetch = 0 : i64, scratch_operands = 1 : i64, tpu.core_type = #tpu.core_type<tc>, window_params = [{transform_indices = @transform_0, window_bounds = array<i64: 1, 32, 256>}, {pipeline_mode = #tpu.pipeline_mode<synchronous>, transform_indices = @transform_1, window_bounds = array<i64: 9, 256>}, {pipeline_mode = #tpu.pipeline_mode<synchronous>, transform_indices = @transform_2, window_bounds = array<i64: 16, 32>}, {pipeline_mode = #tpu.pipeline_mode<synchronous>, transform_indices = @transform_3, window_bounds = array<i64: 16, 144>}, {pipeline_mode = #tpu.pipeline_mode<synchronous>, transform_indices = @transform_4, window_bounds = array<i64: 32, 16>}, {pipeline_mode = #tpu.pipeline_mode<synchronous>, transform_indices = @transform_5, window_bounds = array<i64: 16, 32>}, {pipeline_mode = #tpu.pipeline_mode<synchronous>, transform_indices = @transform_6, window_bounds = array<i64: 16, 144>}, {pipeline_mode = #tpu.pipeline_mode<synchronous>, transform_indices = @transform_7, window_bounds = array<i64: 32, 16>}, {pipeline_mode = #tpu.pipeline_mode<synchronous>, transform_indices = @transform_8, window_bounds = array<i64: 32, 32>}, {pipeline_mode = #tpu.pipeline_mode<synchronous>, transform_indices = @transform_9, window_bounds = array<i64: 32, 32>}, {pipeline_mode = #tpu.pipeline_mode<synchronous>, transform_indices = @transform_10, window_bounds = array<i64: 32, 8>}, {transform_indices = @transform_11, window_bounds = array<i64: 1, 32, 256>}]} {
    %c0 = arith.constant 0 : index
    %c0_0 = arith.constant 0 : index
    %c0_1 = arith.constant 0 : index
    %0 = vector.load %arg1[%c0, %c0_0, %c0_1] : memref<1x32x256xf32, #tpu.memory_space<vmem>>, vector<1x32x256xf32>
    %1 = vector.shape_cast %0 : vector<1x32x256xf32> to vector<32x256xf32>
    %c0_2 = arith.constant 0 : index
    %c0_3 = arith.constant 0 : index
    %2 = vector.load %arg2[%c0_2, %c0_3] : memref<9x256xf32, #tpu.memory_space<vmem>>, vector<9x256xf32>
    %c0_4 = arith.constant 0 : index
    %c0_5 = arith.constant 0 : index
    %3 = vector.load %arg11[%c0_4, %c0_5] : memref<32x8xf32, #tpu.memory_space<vmem>>, vector<32x8xf32>
    %4 = vector.extract_strided_slice %3 {offsets = [0, 0], sizes = [16, 1], strides = [1, 1]} : vector<32x8xf32> to vector<16x1xf32>
    %5 = vector.extract_strided_slice %3 {offsets = [0, 1], sizes = [16, 1], strides = [1, 1]} : vector<32x8xf32> to vector<16x1xf32>
    %6 = vector.extract_strided_slice %3 {offsets = [0, 2], sizes = [32, 1], strides = [1, 1]} : vector<32x8xf32> to vector<32x1xf32>
    %7 = vector.extract_strided_slice %3 {offsets = [0, 3], sizes = [16, 1], strides = [1, 1]} : vector<32x8xf32> to vector<16x1xf32>
    %8 = vector.extract_strided_slice %3 {offsets = [0, 4], sizes = [16, 1], strides = [1, 1]} : vector<32x8xf32> to vector<16x1xf32>
    %9 = vector.extract_strided_slice %3 {offsets = [0, 5], sizes = [32, 1], strides = [1, 1]} : vector<32x8xf32> to vector<32x1xf32>
    %10 = vector.extract_strided_slice %3 {offsets = [0, 6], sizes = [32, 1], strides = [1, 1]} : vector<32x8xf32> to vector<32x1xf32>
    %c0_6 = arith.constant 0 : index
    %c0_7 = arith.constant 0 : index
    %11 = vector.load %arg3[%c0_6, %c0_7] : memref<16x32xf32, #tpu.memory_space<vmem>>, vector<16x32xf32>
    %cst = arith.constant dense<0.000000e+00> : vector<16x256xf32>
    %12 = tpu.matmul %11, %1, %cst {dimension_numbers = #tpu.dot_dimension_numbers<[1], [0], [0], [1], [0, 0, 1, 1], [], []>} : vector<16x32xf32>, vector<32x256xf32>, vector<16x256xf32> -> vector<16x256xf32>
    %13 = vector.broadcast %4 : vector<16x1xf32> to vector<16x256xf32>
    %14 = arith.addf %12, %13 : vector<16x256xf32>
    %cst_8 = arith.constant 0.000000e+00 : f32
    %15 = vector.broadcast %cst_8 : f32 to vector<16x256xf32>
    %16 = arith.maximumf %14, %15 : vector<16x256xf32>
    %c17_i32 = arith.constant 17 : i32
    %17 = tpu.dynamic_rotate %16 by %c17_i32 dim 1 : vector<16x256xf32>, i32 -> vector<16x256xf32>
    %18 = vector.extract_strided_slice %2 {offsets = [0, 0], sizes = [1, 256], strides = [1, 1]} : vector<9x256xf32> to vector<1x256xf32>
    %19 = vector.broadcast %18 : vector<1x256xf32> to vector<16x256xf32>
    %20 = arith.mulf %17, %19 : vector<16x256xf32>
    %c0_9 = arith.constant 0 : index
    %c0_10 = arith.constant 0 : index
    %21 = vector.load %arg13[%c0_9, %c0_10] : memref<144x256xf32, #tpu.memory_space<vmem>>, vector<16x256xf32>
    tpu.vector_store %arg13[%c0_9, %c0_10], %20 {strides = array<i32>} : memref<144x256xf32, #tpu.memory_space<vmem>>, vector<16x256xf32>,
    %c16_i32 = arith.constant 16 : i32
    %22 = tpu.dynamic_rotate %16 by %c16_i32 dim 1 : vector<16x256xf32>, i32 -> vector<16x256xf32>
    %23 = vector.extract_strided_slice %2 {offsets = [1, 0], sizes = [1, 256], strides = [1, 1]} : vector<9x256xf32> to vector<1x256xf32>
    %24 = vector.broadcast %23 : vector<1x256xf32> to vector<16x256xf32>
    %25 = arith.mulf %22, %24 : vector<16x256xf32>
    %c16 = arith.constant 16 : index
    %c0_11 = arith.constant 0 : index
    %26 = vector.load %arg13[%c16, %c0_11] : memref<144x256xf32, #tpu.memory_space<vmem>>, vector<16x256xf32>
    tpu.vector_store %arg13[%c16, %c0_11], %25 {strides = array<i32>} : memref<144x256xf32, #tpu.memory_space<vmem>>, vector<16x256xf32>,
    %c15_i32 = arith.constant 15 : i32
    %27 = tpu.dynamic_rotate %16 by %c15_i32 dim 1 : vector<16x256xf32>, i32 -> vector<16x256xf32>
    %28 = vector.extract_strided_slice %2 {offsets = [2, 0], sizes = [1, 256], strides = [1, 1]} : vector<9x256xf32> to vector<1x256xf32>
    %29 = vector.broadcast %28 : vector<1x256xf32> to vector<16x256xf32>
    %30 = arith.mulf %27, %29 : vector<16x256xf32>
    %c32 = arith.constant 32 : index
    %c0_12 = arith.constant 0 : index
    %31 = vector.load %arg13[%c32, %c0_12] : memref<144x256xf32, #tpu.memory_space<vmem>>, vector<16x256xf32>
    tpu.vector_store %arg13[%c32, %c0_12], %30 {strides = array<i32>} : memref<144x256xf32, #tpu.memory_space<vmem>>, vector<16x256xf32>,
    %c1_i32 = arith.constant 1 : i32
    %32 = tpu.dynamic_rotate %16 by %c1_i32 dim 1 : vector<16x256xf32>, i32 -> vector<16x256xf32>
    %33 = vector.extract_strided_slice %2 {offsets = [3, 0], sizes = [1, 256], strides = [1, 1]} : vector<9x256xf32> to vector<1x256xf32>
    %34 = vector.broadcast %33 : vector<1x256xf32> to vector<16x256xf32>
    %35 = arith.mulf %32, %34 : vector<16x256xf32>
    %c48 = arith.constant 48 : index
    %c0_13 = arith.constant 0 : index
    %36 = vector.load %arg13[%c48, %c0_13] : memref<144x256xf32, #tpu.memory_space<vmem>>, vector<16x256xf32>
    tpu.vector_store %arg13[%c48, %c0_13], %35 {strides = array<i32>} : memref<144x256xf32, #tpu.memory_space<vmem>>, vector<16x256xf32>,
    %c64 = arith.constant 64 : index
    %c0_14 = arith.constant 0 : index
    %37 = vector.load %arg13[%c64, %c0_14] : memref<144x256xf32, #tpu.memory_space<vmem>>, vector<16x256xf32>
    tpu.vector_store %arg13[%c64, %c0_14], %16 {strides = array<i32>} : memref<144x256xf32, #tpu.memory_space<vmem>>, vector<16x256xf32>,
    %c255_i32 = arith.constant 255 : i32
    %38 = tpu.dynamic_rotate %16 by %c255_i32 dim 1 : vector<16x256xf32>, i32 -> vector<16x256xf32>
    %39 = vector.extract_strided_slice %2 {offsets = [5, 0], sizes = [1, 256], strides = [1, 1]} : vector<9x256xf32> to vector<1x256xf32>
    %40 = vector.broadcast %39 : vector<1x256xf32> to vector<16x256xf32>
    %41 = arith.mulf %38, %40 : vector<16x256xf32>
    %c80 = arith.constant 80 : index
    %c0_15 = arith.constant 0 : index
    %42 = vector.load %arg13[%c80, %c0_15] : memref<144x256xf32, #tpu.memory_space<vmem>>, vector<16x256xf32>
    tpu.vector_store %arg13[%c80, %c0_15], %41 {strides = array<i32>} : memref<144x256xf32, #tpu.memory_space<vmem>>, vector<16x256xf32>,
    %c241_i32 = arith.constant 241 : i32
    %43 = tpu.dynamic_rotate %16 by %c241_i32 dim 1 : vector<16x256xf32>, i32 -> vector<16x256xf32>
    %44 = vector.extract_strided_slice %2 {offsets = [6, 0], sizes = [1, 256], strides = [1, 1]} : vector<9x256xf32> to vector<1x256xf32>
    %45 = vector.broadcast %44 : vector<1x256xf32> to vector<16x256xf32>
    %46 = arith.mulf %43, %45 : vector<16x256xf32>
    %c96 = arith.constant 96 : index
    %c0_16 = arith.constant 0 : index
    %47 = vector.load %arg13[%c96, %c0_16] : memref<144x256xf32, #tpu.memory_space<vmem>>, vector<16x256xf32>
    tpu.vector_store %arg13[%c96, %c0_16], %46 {strides = array<i32>} : memref<144x256xf32, #tpu.memory_space<vmem>>, vector<16x256xf32>,
    %c240_i32 = arith.constant 240 : i32
    %48 = tpu.dynamic_rotate %16 by %c240_i32 dim 1 : vector<16x256xf32>, i32 -> vector<16x256xf32>
    %49 = vector.extract_strided_slice %2 {offsets = [7, 0], sizes = [1, 256], strides = [1, 1]} : vector<9x256xf32> to vector<1x256xf32>
    %50 = vector.broadcast %49 : vector<1x256xf32> to vector<16x256xf32>
    %51 = arith.mulf %48, %50 : vector<16x256xf32>
    %c112 = arith.constant 112 : index
    %c0_17 = arith.constant 0 : index
    %52 = vector.load %arg13[%c112, %c0_17] : memref<144x256xf32, #tpu.memory_space<vmem>>, vector<16x256xf32>
    tpu.vector_store %arg13[%c112, %c0_17], %51 {strides = array<i32>} : memref<144x256xf32, #tpu.memory_space<vmem>>, vector<16x256xf32>,
    %c239_i32 = arith.constant 239 : i32
    %53 = tpu.dynamic_rotate %16 by %c239_i32 dim 1 : vector<16x256xf32>, i32 -> vector<16x256xf32>
    %54 = vector.extract_strided_slice %2 {offsets = [8, 0], sizes = [1, 256], strides = [1, 1]} : vector<9x256xf32> to vector<1x256xf32>
    %55 = vector.broadcast %54 : vector<1x256xf32> to vector<16x256xf32>
    %56 = arith.mulf %53, %55 : vector<16x256xf32>
    %c128 = arith.constant 128 : index
    %c0_18 = arith.constant 0 : index
    %57 = vector.load %arg13[%c128, %c0_18] : memref<144x256xf32, #tpu.memory_space<vmem>>, vector<16x256xf32>
    tpu.vector_store %arg13[%c128, %c0_18], %56 {strides = array<i32>} : memref<144x256xf32, #tpu.memory_space<vmem>>, vector<16x256xf32>,
    %c0_19 = arith.constant 0 : index
    %c0_20 = arith.constant 0 : index
    %58 = vector.load %arg4[%c0_19, %c0_20] : memref<16x144xf32, #tpu.memory_space<vmem>>, vector<16x144xf32>
    %c0_21 = arith.constant 0 : index
    %c0_22 = arith.constant 0 : index
    %59 = vector.load %arg13[%c0_21, %c0_22] : memref<144x256xf32, #tpu.memory_space<vmem>>, vector<144x256xf32>
    %cst_23 = arith.constant dense<0.000000e+00> : vector<16x256xf32>
    %60 = tpu.matmul %58, %59, %cst_23 {dimension_numbers = #tpu.dot_dimension_numbers<[1], [0], [0], [1], [0, 0, 1, 1], [], []>} : vector<16x144xf32>, vector<144x256xf32>, vector<16x256xf32> -> vector<16x256xf32>
    %61 = vector.broadcast %5 : vector<16x1xf32> to vector<16x256xf32>
    %62 = arith.addf %60, %61 : vector<16x256xf32>
    %cst_24 = arith.constant 0.000000e+00 : f32
    %63 = vector.broadcast %cst_24 : f32 to vector<16x256xf32>
    %64 = arith.maximumf %62, %63 : vector<16x256xf32>
    %c0_25 = arith.constant 0 : index
    %c0_26 = arith.constant 0 : index
    %65 = vector.load %arg5[%c0_25, %c0_26] : memref<32x16xf32, #tpu.memory_space<vmem>>, vector<32x16xf32>
    %cst_27 = arith.constant dense<0.000000e+00> : vector<32x256xf32>
    %66 = tpu.matmul %65, %64, %cst_27 {dimension_numbers = #tpu.dot_dimension_numbers<[1], [0], [0], [1], [0, 0, 1, 1], [], []>} : vector<32x16xf32>, vector<16x256xf32>, vector<32x256xf32> -> vector<32x256xf32>
    %67 = vector.broadcast %6 : vector<32x1xf32> to vector<32x256xf32>
    %68 = arith.addf %66, %67 : vector<32x256xf32>
    %69 = arith.addf %68, %1 : vector<32x256xf32>
    %cst_28 = arith.constant 0.000000e+00 : f32
    %70 = vector.broadcast %cst_28 : f32 to vector<32x256xf32>
    %71 = arith.maximumf %69, %70 : vector<32x256xf32>
    %c0_29 = arith.constant 0 : index
    %c0_30 = arith.constant 0 : index
    %72 = vector.load %arg6[%c0_29, %c0_30] : memref<16x32xf32, #tpu.memory_space<vmem>>, vector<16x32xf32>
    %cst_31 = arith.constant dense<0.000000e+00> : vector<16x256xf32>
    %73 = tpu.matmul %72, %71, %cst_31 {dimension_numbers = #tpu.dot_dimension_numbers<[1], [0], [0], [1], [0, 0, 1, 1], [], []>} : vector<16x32xf32>, vector<32x256xf32>, vector<16x256xf32> -> vector<16x256xf32>
    %74 = vector.broadcast %7 : vector<16x1xf32> to vector<16x256xf32>
    %75 = arith.addf %73, %74 : vector<16x256xf32>
    %cst_32 = arith.constant 0.000000e+00 : f32
    %76 = vector.broadcast %cst_32 : f32 to vector<16x256xf32>
    %77 = arith.maximumf %75, %76 : vector<16x256xf32>
    %c17_i32_33 = arith.constant 17 : i32
    %78 = tpu.dynamic_rotate %77 by %c17_i32_33 dim 1 : vector<16x256xf32>, i32 -> vector<16x256xf32>
    %79 = vector.extract_strided_slice %2 {offsets = [0, 0], sizes = [1, 256], strides = [1, 1]} : vector<9x256xf32> to vector<1x256xf32>
    %80 = vector.broadcast %79 : vector<1x256xf32> to vector<16x256xf32>
    %81 = arith.mulf %78, %80 : vector<16x256xf32>
    %c0_34 = arith.constant 0 : index
    %c0_35 = arith.constant 0 : index
    %82 = vector.load %arg13[%c0_34, %c0_35] : memref<144x256xf32, #tpu.memory_space<vmem>>, vector<16x256xf32>
    tpu.vector_store %arg13[%c0_34, %c0_35], %81 {strides = array<i32>} : memref<144x256xf32, #tpu.memory_space<vmem>>, vector<16x256xf32>,
    %c16_i32_36 = arith.constant 16 : i32
    %83 = tpu.dynamic_rotate %77 by %c16_i32_36 dim 1 : vector<16x256xf32>, i32 -> vector<16x256xf32>
    %84 = vector.extract_strided_slice %2 {offsets = [1, 0], sizes = [1, 256], strides = [1, 1]} : vector<9x256xf32> to vector<1x256xf32>
    %85 = vector.broadcast %84 : vector<1x256xf32> to vector<16x256xf32>
    %86 = arith.mulf %83, %85 : vector<16x256xf32>
    %c16_37 = arith.constant 16 : index
    %c0_38 = arith.constant 0 : index
    %87 = vector.load %arg13[%c16_37, %c0_38] : memref<144x256xf32, #tpu.memory_space<vmem>>, vector<16x256xf32>
    tpu.vector_store %arg13[%c16_37, %c0_38], %86 {strides = array<i32>} : memref<144x256xf32, #tpu.memory_space<vmem>>, vector<16x256xf32>,
    %c15_i32_39 = arith.constant 15 : i32
    %88 = tpu.dynamic_rotate %77 by %c15_i32_39 dim 1 : vector<16x256xf32>, i32 -> vector<16x256xf32>
    %89 = vector.extract_strided_slice %2 {offsets = [2, 0], sizes = [1, 256], strides = [1, 1]} : vector<9x256xf32> to vector<1x256xf32>
    %90 = vector.broadcast %89 : vector<1x256xf32> to vector<16x256xf32>
    %91 = arith.mulf %88, %90 : vector<16x256xf32>
    %c32_40 = arith.constant 32 : index
    %c0_41 = arith.constant 0 : index
    %92 = vector.load %arg13[%c32_40, %c0_41] : memref<144x256xf32, #tpu.memory_space<vmem>>, vector<16x256xf32>
    tpu.vector_store %arg13[%c32_40, %c0_41], %91 {strides = array<i32>} : memref<144x256xf32, #tpu.memory_space<vmem>>, vector<16x256xf32>,
    %c1_i32_42 = arith.constant 1 : i32
    %93 = tpu.dynamic_rotate %77 by %c1_i32_42 dim 1 : vector<16x256xf32>, i32 -> vector<16x256xf32>
    %94 = vector.extract_strided_slice %2 {offsets = [3, 0], sizes = [1, 256], strides = [1, 1]} : vector<9x256xf32> to vector<1x256xf32>
    %95 = vector.broadcast %94 : vector<1x256xf32> to vector<16x256xf32>
    %96 = arith.mulf %93, %95 : vector<16x256xf32>
    %c48_43 = arith.constant 48 : index
    %c0_44 = arith.constant 0 : index
    %97 = vector.load %arg13[%c48_43, %c0_44] : memref<144x256xf32, #tpu.memory_space<vmem>>, vector<16x256xf32>
    tpu.vector_store %arg13[%c48_43, %c0_44], %96 {strides = array<i32>} : memref<144x256xf32, #tpu.memory_space<vmem>>, vector<16x256xf32>,
    %c64_45 = arith.constant 64 : index
    %c0_46 = arith.constant 0 : index
    %98 = vector.load %arg13[%c64_45, %c0_46] : memref<144x256xf32, #tpu.memory_space<vmem>>, vector<16x256xf32>
    tpu.vector_store %arg13[%c64_45, %c0_46], %77 {strides = array<i32>} : memref<144x256xf32, #tpu.memory_space<vmem>>, vector<16x256xf32>,
    %c255_i32_47 = arith.constant 255 : i32
    %99 = tpu.dynamic_rotate %77 by %c255_i32_47 dim 1 : vector<16x256xf32>, i32 -> vector<16x256xf32>
    %100 = vector.extract_strided_slice %2 {offsets = [5, 0], sizes = [1, 256], strides = [1, 1]} : vector<9x256xf32> to vector<1x256xf32>
    %101 = vector.broadcast %100 : vector<1x256xf32> to vector<16x256xf32>
    %102 = arith.mulf %99, %101 : vector<16x256xf32>
    %c80_48 = arith.constant 80 : index
    %c0_49 = arith.constant 0 : index
    %103 = vector.load %arg13[%c80_48, %c0_49] : memref<144x256xf32, #tpu.memory_space<vmem>>, vector<16x256xf32>
    tpu.vector_store %arg13[%c80_48, %c0_49], %102 {strides = array<i32>} : memref<144x256xf32, #tpu.memory_space<vmem>>, vector<16x256xf32>,
    %c241_i32_50 = arith.constant 241 : i32
    %104 = tpu.dynamic_rotate %77 by %c241_i32_50 dim 1 : vector<16x256xf32>, i32 -> vector<16x256xf32>
    %105 = vector.extract_strided_slice %2 {offsets = [6, 0], sizes = [1, 256], strides = [1, 1]} : vector<9x256xf32> to vector<1x256xf32>
    %106 = vector.broadcast %105 : vector<1x256xf32> to vector<16x256xf32>
    %107 = arith.mulf %104, %106 : vector<16x256xf32>
    %c96_51 = arith.constant 96 : index
    %c0_52 = arith.constant 0 : index
    %108 = vector.load %arg13[%c96_51, %c0_52] : memref<144x256xf32, #tpu.memory_space<vmem>>, vector<16x256xf32>
    tpu.vector_store %arg13[%c96_51, %c0_52], %107 {strides = array<i32>} : memref<144x256xf32, #tpu.memory_space<vmem>>, vector<16x256xf32>,
    %c240_i32_53 = arith.constant 240 : i32
    %109 = tpu.dynamic_rotate %77 by %c240_i32_53 dim 1 : vector<16x256xf32>, i32 -> vector<16x256xf32>
    %110 = vector.extract_strided_slice %2 {offsets = [7, 0], sizes = [1, 256], strides = [1, 1]} : vector<9x256xf32> to vector<1x256xf32>
    %111 = vector.broadcast %110 : vector<1x256xf32> to vector<16x256xf32>
    %112 = arith.mulf %109, %111 : vector<16x256xf32>
    %c112_54 = arith.constant 112 : index
    %c0_55 = arith.constant 0 : index
    %113 = vector.load %arg13[%c112_54, %c0_55] : memref<144x256xf32, #tpu.memory_space<vmem>>, vector<16x256xf32>
    tpu.vector_store %arg13[%c112_54, %c0_55], %112 {strides = array<i32>} : memref<144x256xf32, #tpu.memory_space<vmem>>, vector<16x256xf32>,
    %c239_i32_56 = arith.constant 239 : i32
    %114 = tpu.dynamic_rotate %77 by %c239_i32_56 dim 1 : vector<16x256xf32>, i32 -> vector<16x256xf32>
    %115 = vector.extract_strided_slice %2 {offsets = [8, 0], sizes = [1, 256], strides = [1, 1]} : vector<9x256xf32> to vector<1x256xf32>
    %116 = vector.broadcast %115 : vector<1x256xf32> to vector<16x256xf32>
    %117 = arith.mulf %114, %116 : vector<16x256xf32>
    %c128_57 = arith.constant 128 : index
    %c0_58 = arith.constant 0 : index
    %118 = vector.load %arg13[%c128_57, %c0_58] : memref<144x256xf32, #tpu.memory_space<vmem>>, vector<16x256xf32>
    tpu.vector_store %arg13[%c128_57, %c0_58], %117 {strides = array<i32>} : memref<144x256xf32, #tpu.memory_space<vmem>>, vector<16x256xf32>,
    %c0_59 = arith.constant 0 : index
    %c0_60 = arith.constant 0 : index
    %119 = vector.load %arg7[%c0_59, %c0_60] : memref<16x144xf32, #tpu.memory_space<vmem>>, vector<16x144xf32>
    %c0_61 = arith.constant 0 : index
    %c0_62 = arith.constant 0 : index
    %120 = vector.load %arg13[%c0_61, %c0_62] : memref<144x256xf32, #tpu.memory_space<vmem>>, vector<144x256xf32>
    %cst_63 = arith.constant dense<0.000000e+00> : vector<16x256xf32>
    %121 = tpu.matmul %119, %120, %cst_63 {dimension_numbers = #tpu.dot_dimension_numbers<[1], [0], [0], [1], [0, 0, 1, 1], [], []>} : vector<16x144xf32>, vector<144x256xf32>, vector<16x256xf32> -> vector<16x256xf32>
    %122 = vector.broadcast %8 : vector<16x1xf32> to vector<16x256xf32>
    %123 = arith.addf %121, %122 : vector<16x256xf32>
    %cst_64 = arith.constant 0.000000e+00 : f32
    %124 = vector.broadcast %cst_64 : f32 to vector<16x256xf32>
    %125 = arith.maximumf %123, %124 : vector<16x256xf32>
    %c0_65 = arith.constant 0 : index
    %c0_66 = arith.constant 0 : index
    %126 = vector.load %arg8[%c0_65, %c0_66] : memref<32x16xf32, #tpu.memory_space<vmem>>, vector<32x16xf32>
    %cst_67 = arith.constant dense<0.000000e+00> : vector<32x256xf32>
    %127 = tpu.matmul %126, %125, %cst_67 {dimension_numbers = #tpu.dot_dimension_numbers<[1], [0], [0], [1], [0, 0, 1, 1], [], []>} : vector<32x16xf32>, vector<16x256xf32>, vector<32x256xf32> -> vector<32x256xf32>
    %128 = vector.broadcast %9 : vector<32x1xf32> to vector<32x256xf32>
    %129 = arith.addf %127, %128 : vector<32x256xf32>
    %130 = arith.addf %129, %71 : vector<32x256xf32>
    %cst_68 = arith.constant 0.000000e+00 : f32
    %131 = vector.broadcast %cst_68 : f32 to vector<32x256xf32>
    %132 = arith.maximumf %130, %131 : vector<32x256xf32>
    %c0_69 = arith.constant 0 : index
    %c0_70 = arith.constant 0 : index
    %133 = vector.load %arg9[%c0_69, %c0_70] : memref<32x32xf32, #tpu.memory_space<vmem>>, vector<32x32xf32>
    %cst_71 = arith.constant dense<0.000000e+00> : vector<32x256xf32>
    %134 = tpu.matmul %133, %132, %cst_71 {dimension_numbers = #tpu.dot_dimension_numbers<[1], [0], [0], [1], [0, 0, 1, 1], [], []>} : vector<32x32xf32>, vector<32x256xf32>, vector<32x256xf32> -> vector<32x256xf32>
    %c0_72 = arith.constant 0 : index
    %c0_73 = arith.constant 0 : index
    %135 = vector.load %arg10[%c0_72, %c0_73] : memref<32x32xf32, #tpu.memory_space<vmem>>, vector<32x32xf32>
    %cst_74 = arith.constant dense<0.000000e+00> : vector<32x256xf32>
    %136 = tpu.matmul %135, %71, %cst_74 {dimension_numbers = #tpu.dot_dimension_numbers<[1], [0], [0], [1], [0, 0, 1, 1], [], []>} : vector<32x32xf32>, vector<32x256xf32>, vector<32x256xf32> -> vector<32x256xf32>
    %137 = arith.addf %134, %136 : vector<32x256xf32>
    %138 = vector.broadcast %10 : vector<32x1xf32> to vector<32x256xf32>
    %139 = arith.addf %137, %138 : vector<32x256xf32>
    %cst_75 = arith.constant 0.000000e+00 : f32
    %140 = vector.broadcast %cst_75 : f32 to vector<32x256xf32>
    %141 = arith.maximumf %139, %140 : vector<32x256xf32>
    %c0_76 = arith.constant 0 : index
    %c0_77 = arith.constant 0 : index
    %c0_78 = arith.constant 0 : index
    %142 = vector.load %arg12[%c0_76, %c0_77, %c0_78] : memref<1x32x256xf32, #tpu.memory_space<vmem>>, vector<1x32x256xf32>
    %143 = vector.shape_cast %142 : vector<1x32x256xf32> to vector<32x256xf32>
    %144 = vector.shape_cast %141 : vector<32x256xf32> to vector<1x32x256xf32>
    tpu.vector_store %arg12[%c0_76, %c0_77, %c0_78], %144 {strides = array<i32>} : memref<1x32x256xf32, #tpu.memory_space<vmem>>, vector<1x32x256xf32>,
    return
  }
  func.func @transform_0(%arg0: i32) -> (i32, i32, i32) {
    %c0_i32 = arith.constant 0 : i32
    %c0_i32_0 = arith.constant 0 : i32
    %c0_i32_1 = arith.constant 0 : i32
    return %arg0, %c0_i32, %c0_i32_0 : i32, i32, i32
  }
  func.func @transform_1(%arg0: i32) -> (i32, i32) {
    %c0_i32 = arith.constant 0 : i32
    %c0_i32_0 = arith.constant 0 : i32
    %c0_i32_1 = arith.constant 0 : i32
    return %c0_i32, %c0_i32_0 : i32, i32
  }
  func.func @transform_2(%arg0: i32) -> (i32, i32) {
    %c0_i32 = arith.constant 0 : i32
    %c0_i32_0 = arith.constant 0 : i32
    %c0_i32_1 = arith.constant 0 : i32
    return %c0_i32, %c0_i32_0 : i32, i32
  }
  func.func @transform_3(%arg0: i32) -> (i32, i32) {
    %c0_i32 = arith.constant 0 : i32
    %c0_i32_0 = arith.constant 0 : i32
    %c0_i32_1 = arith.constant 0 : i32
    return %c0_i32, %c0_i32_0 : i32, i32
  }
  func.func @transform_4(%arg0: i32) -> (i32, i32) {
    %c0_i32 = arith.constant 0 : i32
    %c0_i32_0 = arith.constant 0 : i32
    %c0_i32_1 = arith.constant 0 : i32
    return %c0_i32, %c0_i32_0 : i32, i32
  }
  func.func @transform_5(%arg0: i32) -> (i32, i32) {
    %c0_i32 = arith.constant 0 : i32
    %c0_i32_0 = arith.constant 0 : i32
    %c0_i32_1 = arith.constant 0 : i32
    return %c0_i32, %c0_i32_0 : i32, i32
  }
  func.func @transform_6(%arg0: i32) -> (i32, i32) {
    %c0_i32 = arith.constant 0 : i32
    %c0_i32_0 = arith.constant 0 : i32
    %c0_i32_1 = arith.constant 0 : i32
    return %c0_i32, %c0_i32_0 : i32, i32
  }
  func.func @transform_7(%arg0: i32) -> (i32, i32) {
    %c0_i32 = arith.constant 0 : i32
    %c0_i32_0 = arith.constant 0 : i32
    %c0_i32_1 = arith.constant 0 : i32
    return %c0_i32, %c0_i32_0 : i32, i32
  }
  func.func @transform_8(%arg0: i32) -> (i32, i32) {
    %c0_i32 = arith.constant 0 : i32
    %c0_i32_0 = arith.constant 0 : i32
    %c0_i32_1 = arith.constant 0 : i32
    return %c0_i32, %c0_i32_0 : i32, i32
  }
  func.func @transform_9(%arg0: i32) -> (i32, i32) {
    %c0_i32 = arith.constant 0 : i32
    %c0_i32_0 = arith.constant 0 : i32
    %c0_i32_1 = arith.constant 0 : i32
    return %c0_i32, %c0_i32_0 : i32, i32
  }
  func.func @transform_10(%arg0: i32) -> (i32, i32) {
    %c0_i32 = arith.constant 0 : i32
    %c0_i32_0 = arith.constant 0 : i32
    %c0_i32_1 = arith.constant 0 : i32
    return %c0_i32, %c0_i32_0 : i32, i32
  }
  func.func @transform_11(%arg0: i32) -> (i32, i32, i32) {
    %c0_i32 = arith.constant 0 : i32
    %c0_i32_0 = arith.constant 0 : i32
    %c0_i32_1 = arith.constant 0 : i32
    return %arg0, %c0_i32, %c0_i32_0 : i32, i32, i32
  }
}

</mosaic_0001>

<bundles_post_ra>
// kernel: tpu_custom_call.1
= control target key start
LH: loop header
LB: loop body
LE: loop exit
PB: predicated region body
PF: predicated region fallthrough
CT: control target
= control target key end

     0   :  { %16 = vsyncpa [#allocation4], 0  ;;  %s3461_s0 = inlined_call_operand.vmem [shape: f32[2,32,256], index: 0, kind: input, shape index: {}]   ;;  %s3462_s1 = inlined_call_operand.hbm [shape: f32[9,256], index: 1, kind: input, shape index: {}]   ;;  %s3463_s2 = inlined_call_operand.hbm [shape: f32[16,32], index: 2, kind: input, shape index: {}]   ;;  %s3464_s3 = inlined_call_operand.hbm [shape: f32[16,144], index: 3, kind: input, shape index: {}]   ;;  %s3465_s4 = inlined_call_operand.vmem [shape: f32[32,16], index: 4, kind: input, shape index: {}]   ;;  %s3466_s5 = inlined_call_operand.hbm [shape: f32[16,32], index: 5, kind: input, shape index: {}]   ;;  %s3467_s6 = inlined_call_operand.hbm [shape: f32[16,144], index: 6, kind: input, shape index: {}]   ;;  %s3468_s7 = inlined_call_operand.vmem [shape: f32[32,16], index: 7, kind: input, shape index: {}]   ;;  %s3469_s8 = inlined_call_operand.hbm [shape: f32[32,32], index: 8, kind: input, shape index: {}]   ;;  %s3470_s9 = inlined_call_operand.hbm [shape: f32[32,32], index: 9, kind: input, shape index: {}]   ;;  %s3471_s10 = inlined_call_operand.vmem [shape: f32[32,8], index: 10, kind: input, shape index: {}]   ;;  %s3472_s11 = inlined_call_operand.hbm [shape: f32[2,32,256], index: 11, kind: output, shape index: {}]  }
   0x1   :  { %17 = vsyncpa [#allocation7], 0 }
   0x2   :  { %18 = vsyncpa [#allocation10], 0 }
   0x3   :  { %19 = vsyncpa [#allocation13], 0 }
   0x4   :  { %20 = vsyncpa [#allocation5], 0 }
   0x5   :  { %22 = vsyncpa [#allocation5 + $0x1], 0  ;;  %s2593_s17 = smov 0   ;;  %s2595_s18 = smov 0  }
   0x6   :  { %s2597_s19 = smov 0   ;;  %s2599_s20 = smov 0  }
   0x7 LB: > { %3481 = sst [smem:[#allocation21_spill]] %s2498_s19  ;;  %s2614_s21 = sadd.s32 4294967295, %s2502_s20   ;;  %s2502_s20 = sphi %s2599_s20, %s3501_s20   ;;  %s2498_s19 = sphi %s2597_s19, %s3503_s19   ;;  %s2494_s18 = sphi %s2595_s18, %s3505_s18   ;;  %s2490_s17 = sphi %s2593_s17, %s3504_s17  }
   0x8   : > { %s2044_s22 = sadd.s32 4294967294, %s2502_s20   ;;  %s2618_s23 = sadd.s32 1, %s2502_s20  }
   0x9   : > { %3482 = sst [smem:[#allocation22_spill]] %s2618_s23  ;;  %s271_s24 = sadd.s32 1, %s2498_s19 }
   0xa   : > { %s268_s25 = ssub.s32 %s2502_s20, %s2618_s23  ;;  %p281_p0 = scmp.ne.s32.totalorder %s2498_s19, %s2494_s18 }
   0xb   : > { %p269_p1 = scmp.eq.s32.totalorder %s268_s25, 0  ;;  %p282_p2 = scmp.eq.s32.totalorder %s2614_s21, 1 }
   0xc   : > { %p287_p3 = scmp.ne.s32.totalorder %s2494_s18, %s2490_s17  ;;  %p288_p4 = scmp.eq.s32.totalorder %s2044_s22, 1 }
   0xd   : > { %s2629_s26 = scalar_select %p269_p1, %s2498_s19, %s271_s24  }
   0xe   : > { %p2631_p5 = por %p282_p2, %p281_p0  ;;  %p2635_p6 = por %p288_p4, %p287_p3 }
   0xf   : > { %3483 = sst [smem:[#allocation23_spill]] %s2629_s26  ;;  %p2045_p7 = scmp.ge.s32.totalorder %s2502_s20, 1 }
  0x10   : > { %s3485_s28 = scalar_select %p2635_p6, 1, 0 }
  0x11   : > { %p295_p8 = scmp.lt.s32.totalorder %s2502_s20, 3  ;;  %p3476_p9 = scmp.eq.s32.totalorder %s2614_s21, 0 }
  0x12   : > { %s2504_s30 = smov [#allocation6]   ;;  %s2505_s14 = smov [#allocation9]  }
  0x13   : > { %p2642_p10 = pnand %p2045_p7, %p295_p8  ;;  %s320_s12 = sshll.u32 %s2504_s30, 4  ;;  %s321_s12 = int_to_ptr.vmem [resolvable:$true] %s320_s12 }
  0x14   : > { %s349_s15 = sshll.u32 %s2505_s14, 4  ;;  %s2506_s16 = smov [#allocation12]   ;;  %s350_s15 = int_to_ptr.vmem [resolvable:$true] %s349_s15 }
  0x15   : > { %p2128_p11 = pneg %p2642_p10  ;;  %s378_s22 = sshll.u32 %s2506_s16, 4  ;;  %s379_s22 = int_to_ptr.vmem [resolvable:$true] %s378_s22 }
  0x16   : > { %s2255_s25 = scalar_lea.vmem %s321_s12, 256  ;;  %p2263_p3 = scmp.lt.s32.totalorder %s321_s12, %s321_s12 }
  0x17   : > { %p2650_p12 = pnand %p3476_p9, %p2128_p11  ;;  %p2256_p0 = scmp.ne.s32.totalorder %s321_s12, %s2255_s25 }
  0x18   : > { %p2264_p4 = scmp.lt.s32.totalorder %s2255_s25, %s2255_s25 }
  0x19   : > { %p2656_p13 = pneg %p2650_p12 }
  0x1a   : > { %p2265_p7 = por %p2264_p4, %p2263_p3 }
  0x1b   : > { %p2258_p1 = pnand %p2256_p0, %p2656_p13 }
  0x1d   : > { %p2259_p2 = pneg %p2258_p1 }
  0x1f   : > { %p2266_p8 = pnand %p2265_p7, %p2259_p2 }
  0x21   : > { %2269 = shalt.err (!%p2266_p8)
}
  0x22   : > { %s3477_s30 = smov 128   ;;  %s3478_s14 = smov 8  }
  0x23   : > { %2134 = dma.hbm_to_vmem [thread:$0]  (!%p2650_p12), %s3463_s2, 256, %s321_s12, [#allocation7], %s3477_s30, %s3477_s30, %s3478_s14  }
  0x24   : > { %s2281_s19 = scalar_lea.vmem %s350_s15, 256  ;;  %p2289_p3 = scmp.lt.s32.totalorder %s350_s15, %s350_s15 }
  0x25   : > { %p2282_p11 = scmp.ne.s32.totalorder %s350_s15, %s2281_s19  ;;  %p2290_p2 = scmp.lt.s32.totalorder %s2281_s19, %s2281_s19 }
  0x27   : > { %p2284_p0 = pnand %p2282_p11, %p2656_p13  ;;  %p2291_p4 = por %p2290_p2, %p2289_p3 }
  0x29   : > { %p2285_p1 = pneg %p2284_p0 }
  0x2b   : > { %p2292_p7 = pnand %p2291_p4, %p2285_p1 }
  0x2d   : > { %2295 = shalt.err (!%p2292_p7)
}
  0x2e   : > { %2140 = dma.hbm_to_vmem [thread:$0]  (!%p2650_p12), %s3466_s5, 256, %s350_s15, [#allocation10], %s3477_s30, %s3477_s30, %s3478_s14  }
  0x2f   : > { %s2307_s26 = scalar_lea.vmem %s379_s22, 512  ;;  %p2315_p9 = scmp.lt.s32.totalorder %s379_s22, %s379_s22 }
  0x30   : > { %p2308_p8 = scmp.ne.s32.totalorder %s379_s22, %s2307_s26  ;;  %p2316_p3 = scmp.lt.s32.totalorder %s2307_s26, %s2307_s26 }
  0x32   : > { %p2310_p11 = pnand %p2308_p8, %p2656_p13  ;;  %p2317_p1 = por %p2316_p3, %p2315_p9 }
  0x34   : > { %p2311_p0 = pneg %p2310_p11 }
  0x36   : > { %p2318_p2 = pnand %p2317_p1, %p2311_p0 }
  0x38   : > { %2321 = shalt.err (!%p2318_p2)
}
  0x39   : > { %2146 = dma.hbm_to_vmem [thread:$0]  (!%p2650_p12), %s3469_s8, 512, %s379_s22, [#allocation13], %s3477_s30, %s3477_s30, %s3478_s14  }
  0x3a   : > { %s2509_s12 = smov [#allocation3]  }
  0x3b   : > { %s307_s15 = sshll.u32 %s2509_s12, 4  ;;  %s308_s15 = int_to_ptr.vmem [resolvable:$true] %s307_s15 }
  0x3c   : > { %s2333_s16 = scalar_lea.vmem %s308_s15, 512  ;;  %p2341_p8 = scmp.lt.s32.totalorder %s308_s15, %s308_s15 }
  0x3d   : > { %p2334_p4 = scmp.ne.s32.totalorder %s308_s15, %s2333_s16  ;;  %p2342_p11 = scmp.lt.s32.totalorder %s2333_s16, %s2333_s16 }
  0x3f   : > { %p2336_p7 = pnand %p2334_p4, %p2656_p13  ;;  %p2343_p0 = por %p2342_p11, %p2341_p8 }
  0x41   : > { %p2337_p9 = pneg %p2336_p7 }
  0x43   : > { %p2344_p3 = pnand %p2343_p0, %p2337_p9 }
  0x45   : > { %2347 = shalt.err (!%p2344_p3)
}
  0x46   : > { %s2510_s25 = smov 256   ;;  %s2511_s26 = smov 16  }
  0x47   : > { %2131 = dma.hbm_to_vmem [thread:$0]  (!%p2650_p12), %s3462_s1, 512, %s308_s15, [#allocation4], %s2510_s25, %s2510_s25, %s2511_s26  }
  0x48   : > { %s2512_s23 = smov [#allocation8]   ;;  %s2513_s30 = smov [#allocation11]  }
  0x49   : > { %s333_s12 = sshll.u32 %s2512_s23, 4  ;;  %s362_s14 = sshll.u32 %s2513_s30, 4  ;;  %s334_s12 = int_to_ptr.vmem [resolvable:$true] %s333_s12  ;;  %s363_s14 = int_to_ptr.vmem [resolvable:$true] %s362_s14 }
  0x4a   : > { %s2359_s16 = scalar_lea.vmem %s334_s12, 512  ;;  %p2367_p7 = scmp.lt.s32.totalorder %s334_s12, %s334_s12 }
  0x4b   : > { %p2360_p1 = scmp.ne.s32.totalorder %s334_s12, %s2359_s16  ;;  %p2368_p9 = scmp.lt.s32.totalorder %s2359_s16, %s2359_s16 }
  0x4d   : > { %p2362_p2 = pnand %p2360_p1, %p2656_p13  ;;  %p2369_p8 = por %p2368_p9, %p2367_p7 }
  0x4f   : > { %p2363_p4 = pneg %p2362_p2 }
  0x51   : > { %p2370_p11 = pnand %p2369_p8, %p2363_p4 }
  0x53   : > { %2373 = shalt.err (!%p2370_p11)
}
  0x54   : > { %2137 = dma.hbm_to_vmem [thread:$0]  (!%p2650_p12), %s3464_s3, 512, %s334_s12, [#allocation7], %s2510_s25, %s2510_s25, %s2511_s26  }
  0x55   : > { %s2385_s30 = scalar_lea.vmem %s363_s14, 512  ;;  %p2393_p2 = scmp.lt.s32.totalorder %s363_s14, %s363_s14 }
  0x56   : > { %p2386_p0 = scmp.ne.s32.totalorder %s363_s14, %s2385_s30  ;;  %p2394_p6 = scmp.lt.s32.totalorder %s2385_s30, %s2385_s30 }
  0x58   : > { %p2388_p3 = pnand %p2386_p0, %p2656_p13  ;;  %p2395_p7 = por %p2394_p6, %p2393_p2 }
  0x5a   : > { %p2389_p1 = pneg %p2388_p3 }
  0x5c   : > { %p2396_p4 = pnand %p2395_p7, %p2389_p1 }
  0x5e   : > { %2399 = shalt.err (!%p2396_p4)
}
  0x5f   : > { %2143 = dma.hbm_to_vmem [thread:$0]  (!%p2650_p12), %s3467_s6, 512, %s363_s14, [#allocation10], %s2510_s25, %s2510_s25, %s2511_s26  }
  0x60   : > { %s2514_s12 = smov [#allocation14]  }
  0x61   : > { %s391_s16 = sshll.u32 %s2514_s12, 4  ;;  %s392_s16 = int_to_ptr.vmem [resolvable:$true] %s391_s16 }
  0x62   : > { %s2411_s15 = scalar_lea.vmem %s392_s16, 512  ;;  %p2419_p11 = scmp.lt.s32.totalorder %s392_s16, %s392_s16 }
  0x63   : > { %p2412_p9 = scmp.ne.s32.totalorder %s392_s16, %s2411_s15  ;;  %p2420_p0 = scmp.lt.s32.totalorder %s2411_s15, %s2411_s15 }
  0x65   : > { %p2414_p8 = pnand %p2412_p9, %p2656_p13  ;;  %p2421_p3 = por %p2420_p0, %p2419_p11 }
  0x67   : > { %p2415_p6 = pneg %p2414_p8 }
  0x69   : > { %p2422_p1 = pnand %p2421_p3, %p2415_p6 }
  0x6b   : > { %2425 = shalt.err (!%p2422_p1)
}
  0x6c   : > { %s3489_s22 = smov 8   ;;  %s3490_s30 = smov 128  }
  0x6d   : > { %2149 = dma.hbm_to_vmem [thread:$0]  (!%p2650_p12), %s3470_s9, 512, %s392_s16, [#allocation13], %s3490_s30, %s3490_s30, %s3489_s22  }
  0x6e   : > { %418 = sbr.rel (%p2642_p10) target bundleno = 1986 (0x7c2), region = 64  ;;  %p3491_p13 = scmp.eq.s32.totalorder (!%p2642_p10), %s2614_s21, 0 }
  0x73   : > { %2469 = dma.done.wait (%p3491_p13), [#allocation4], 512   ;;  %p3492_p2 = pmov %p3491_p13 }
  0x75   : > { %2471 = vsyncadd (%p3492_p2), [#allocation4], 4294966784  ;;  %p3493_p7 = pmov %p3492_p2 }
  0x76   : > { %p3494_p4 = pmov %p3492_p2 }
  0x77   : > { %2473 = dma.done.wait (%p3493_p7), [#allocation7], 768  }
  0x78   : > { %2475 = vsyncadd (%p3494_p4), [#allocation7], 4294966528  ;;  %p3495_p9 = pmov %p3492_p2 }
  0x79   : > { %p3496_p12 = pmov %p3492_p2 }
  0x7a   : > { %2477 = dma.done.wait (%p3495_p9), [#allocation10], 768  }
  0x7b   : > { %2479 = vsyncadd (%p3496_p12), [#allocation10], 4294966528  ;;  %p3497_p10 = pmov %p3492_p2 }
  0x7c   : > { %p3498_p8 = pmov %p3492_p2 }
  0x7d   : > { %2481 = dma.done.wait (%p3497_p10), [#allocation13], 1024  }
  0x7e   : > { %2483 = vsyncadd (%p3498_p8), [#allocation13], 4294966272  ;;  %p482_p6 = scmp.lt.s32.totalorder %s2614_s21, 1  ;;  %v2515_v0 = vmov 0.0   ;;  %v2516_v1 = vmov 0   ;;  %v2773_v8 = vld [vmem:[%s3471_s10 + $0x8] sm:$0xff]  ;;  %v611_v39 = vlaneseq }
  0x7f   : > { %586 = vmatprep.mubr.f32.mxu1 %v2515_v0  ;;  %2229 = vset.pattern.permute.xlu0 %v2516_v1  ;;  %v2785_v11 = vld [vmem:[%s3471_s10] sm:$0xff]  ;;  %vm515_vm0 = vcmask 261120   ;;  %v504_v13 = vld [vmem:[#allocation6 + $0x8] sm:$0xff]  ;;  %s2517_s22 = smov 112   ;;  %s2518_s30 = smov 113   ;;  %v842_v28 = vld [vmem:[#allocation8 + $0x8] sm:$0xff] }
  0x80   : > { %s483_s29 = scalar_select %p482_p6, %s2614_s21, 1  ;;  %1075 = vmatprep.mubr.f32.mxu0 %v2515_v0  ;;  %512 = vperm.xlu0 %2229, %v2773_v8   ;;  %v503_v12 = vld [vmem:[#allocation6] sm:$0xff]  ;;  %vm889_vm1 = vcmask 130048   ;;  %v2525_v29 = vmov 1   ;;  %v2879_v42 = vshrl.u32 %v611_v39, 7  ;;  %v2883_v44 = vand.u32 127, %v611_v39 }
  0x81   : > { %s2519_s19 = smov 127   ;;  %s2520_s14 = smov 1   ;;  %2231 = vset.pattern.permute.xlu1 %v2525_v29  ;;  %v2886_v48 = vld [vmem:[#allocation3] sm:$0xff]  ;;  %v2888_v49 = vld [vmem:[#allocation3 + $0x8] sm:$0xff] }
  0x82   : > { %s2096_s13 = sshll.u32 %s483_s29, 6  ;;  %s2521_s29 = smov 15   ;;  %v798_v46 = vsub.s32 7, %v2879_v42  ;;  %vm791_vm2 = vcmp.lt.s32.totalorder %v2883_v44, 112  ;;  %v769_v53 = vsub.s32 6, %v2879_v42  ;;  %vm762_vm3 = vcmp.lt.s32.totalorder %v2883_v44, 113 }
  0x83   : > { %s486_s26 = scalar_lea.vmem %s3461_s0, %s2096_s13  ;;  %s2522_s13 = smov 16   ;;  %vm733_vm4 = vcmp.lt.s32.totalorder %v2883_v44, 127  ;;  %vm700_vm5 = vcmp.lt.s32.totalorder %v2883_v44, 1  ;;  %vm671_vm6 = vcmp.lt.s32.totalorder %v2883_v44, 15  ;;  %vm642_vm7 = vcmp.lt.s32.totalorder %v2883_v44, 16 }
  0x84   : > { %v2755_v2 = vld [vmem:[%s486_s26 + $0x38] sm:$0xff]  ;;  %v2757_v3 = vld [vmem:[%s486_s26 + $0x30] sm:$0xff]  ;;  %v2759_v4 = vld [vmem:[%s486_s26 + $0x28] sm:$0xff]  ;;  %507 = vperm.xlu0 %2229, %v2785_v11   ;;  %s2523_s24 = smov 17   ;;  %s3479_s25 = smov 111   ;;  %v2892_v51 = vrot.slane %v2886_v48, %v798_v46  ;;  %v2895_v52 = vrot.slane %v2888_v49, %v798_v46  ;;  %v2913_v63 = vrot.slane %v2886_v48, %v769_v53  ;;  %v2916_v1 = vrot.slane %v2888_v49, %v769_v53 }
  0x85   : > { %546 = vmatprep.subr.mxu1 %v2755_v2  ;;  %v2762_v5 = vld [vmem:[%s486_s26 + $0x20] sm:$0xff]  ;;  %v2765_v6 = vld [vmem:[%s486_s26 + $0x18] sm:$0xff]  ;;  %v2768_v7 = vld [vmem:[%s486_s26 + $0x10] sm:$0xff]  ;;  %v707_v53 = vsub.s32 3, %v2879_v42  ;;  %vm613_vm8 = vcmp.lt.s32.totalorder %v2883_v44, 17  ;;  %vm820_vm9 = vcmp.lt.s32.totalorder %v2883_v44, 111 }
  0x86   : > { %547 = vmatpush1.msra.mxu1 %v2757_v3  ;;  %v2776_v9 = vld [vmem:[%s486_s26 + $0x8] sm:$0xff]  ;;  %v2780_v10 = vld [vmem:[%s486_s26] sm:$0xff]  ;;  %s2531_s15 = smov [#allocation15]  }
  0x87   : > { %548 = vmatprep.subr.mxu1 %v2759_v4  ;;  %v2242_v44 = vld [vmem:[%s3471_s10 + $0x8] sm:$0xff]  ;;  %s2430_s26 = sshll.u32 %s2531_s15, 4  ;;  %s2431_s26 = int_to_ptr.vmem [resolvable:$false] %s2430_s26 }
  0x88   : > { %549 = vmatpush1.msra.mxu1 %v2762_v5  ;;  %2230 = vset.pattern.permute.xlu0 %v2525_v29 }
  0x89   : > { %550 = vmatprep.subr.mxu1 %v2765_v6 }
  0x8a   : > { %551 = vmatpush1.msra.mxu1 %v2768_v7 }
  0x8b   : > { %552 = vmatprep.subr.mxu1 %v2776_v9 }
  0x8c   : > { %553 = vmatpush1.msra.mxu1 %v2780_v10 }
  0x8d   : > { %2065 = vmatmul.mubr.msk.f32.vlgmr.msra.gmra.mxu1 %vm515_vm0, %v503_v12  ;;  %v740_v12 = vsub.s32 5, %v2879_v42 }
  0x8e   : > { %592 = vmatprep.mubr.f32.mxu1 %v2515_v0 }
  0x91   : > { %2066 = vmatmul.mubr.msk.f32.gmra.mxu1 %vm515_vm0, %v504_v13 }
  0x92   : > { %2069 = vmatprep.mubr.msk.f32.mxu1 %vm889_vm1, %v842_v28  ;;  %v2936_v28 = vrot.slane %v2888_v49, %v740_v12 }
  0xfb   : > { %v513_v14 = vpop.permute.xlu0 %512 }
  0xff   : > { %v508_v15 = vpop.permute.xlu0 %507 }
 0x14d   : > { %v588_v16 = vpop.f32.mrf.mxu1 }
 0x14e   : > { %v589_v17 = vadd.f32 %v588_v16, %v508_v15 }
 0x14f   : > { %v590_v18 = vpop.f32.mrf.mxu1 }
 0x150   : > { %v2794_v19 = vmax.f32 %v589_v17, 0.0  ;;  %v591_v20 = vadd.f32 %v590_v18, %v508_v15 }
 0x151   : > { %v594_v22 = vpop.f32.mrf.mxu1 }
 0x152   : > { %v2796_v21 = vmax.f32 %v591_v20, 0.0  ;;  %783 = vrot.lane.b32.xlu0 %v2794_v19, %s2517_s22  ;;  %v595_v23 = vadd.f32 %v594_v22, %v513_v14 }
 0x153   : > { %v596_v24 = vpop.f32.mrf.mxu1 }
 0x154   : > { %787 = vrot.lane.b32.xlu1 %v2796_v21, %s2517_s22  ;;  %v2820_v25 = vmax.f32 %v595_v23, 0.0  ;;  %v597_v26 = vadd.f32 %v596_v24, %v513_v14 }
 0x156   : > { %754 = vrot.lane.b32.xlu0 %v2794_v19, %s2518_s30  ;;  %v2828_v27 = vmax.f32 %v597_v26, 0.0  ;;  %v2933_v26 = vrot.slane %v2886_v48, %v740_v12 }
 0x158   : > { %758 = vrot.lane.b32.xlu1 %v2796_v21, %s2518_s30 }
 0x15a   : > { %725 = vrot.lane.b32.xlu0 %v2794_v19, %s2519_s19 }
 0x15c   : > { %729 = vrot.lane.b32.xlu1 %v2796_v21, %s2519_s19 }
 0x15e   : > { %692 = vrot.lane.b32.xlu0 %v2794_v19, %s2520_s14 }
 0x160   : > { %696 = vrot.lane.b32.xlu1 %v2796_v21, %s2520_s14 }
 0x162   : > { %663 = vrot.lane.b32.xlu0 %v2794_v19, %s2521_s29 }
 0x164   : > { %667 = vrot.lane.b32.xlu1 %v2796_v21, %s2521_s29 }
 0x166   : > { %634 = vrot.lane.b32.xlu0 %v2794_v19, %s2522_s13 }
 0x168   : > { %638 = vrot.lane.b32.xlu1 %v2796_v21, %s2522_s13 }
 0x16a   : > { %756 = vrot.lane.b32.xlu0 %v2820_v25, %s2518_s30 }
 0x16c   : > { %785 = vrot.lane.b32.xlu1 %v2820_v25, %s2517_s22 }
 0x16e   : > { %727 = vrot.lane.b32.xlu0 %v2820_v25, %s2519_s19 }
 0x170   : > { %789 = vrot.lane.b32.xlu1 %v2828_v27, %s2517_s22 }
 0x172   : > { %603 = vrot.lane.b32.xlu0 %v2794_v19, %s2523_s24 }
 0x174   : > { %760 = vrot.lane.b32.xlu1 %v2828_v27, %s2518_s30 }
 0x176   : > { %694 = vrot.lane.b32.xlu0 %v2820_v25, %s2520_s14 }
 0x178   : > { %731 = vrot.lane.b32.xlu1 %v2828_v27, %s2519_s19 }
 0x17a   : > { %665 = vrot.lane.b32.xlu0 %v2820_v25, %s2521_s29 }
 0x17c   : > { %607 = vrot.lane.b32.xlu1 %v2796_v21, %s2523_s24 }
 0x17e   : > { %636 = vrot.lane.b32.xlu0 %v2820_v25, %s2522_s13 }
 0x180   : > { %698 = vrot.lane.b32.xlu1 %v2828_v27, %s2520_s14 }
 0x182   : > { %605 = vrot.lane.b32.xlu0 %v2820_v25, %s2523_s24 }
 0x184   : > { %669 = vrot.lane.b32.xlu1 %v2828_v27, %s2521_s29 }
 0x186   : > { %814 = vrot.lane.b32.xlu0 %v2820_v25, %s3479_s25 }
 0x188   : > { %640 = vrot.lane.b32.xlu1 %v2828_v27, %s2522_s13 }
 0x18a   : > { %812 = vrot.lane.b32.xlu0 %v2794_v19, %s3479_s25 }
 0x18c   : > { %609 = vrot.lane.b32.xlu1 %v2828_v27, %s2523_s24 }
 0x18e   : > { %886 = vperm.xlu0 %2230, %v2773_v8  }
 0x190   : > { %818 = vrot.lane.b32.xlu1 %v2828_v27, %s3479_s25 }
 0x194   : > { %816 = vrot.lane.b32.xlu1 %v2796_v21, %s3479_s25 }
 0x198   : > { %882 = vperm.xlu1 %2231, %v2785_v11  }
 0x1c4   : > { %v784_v30 = vpop.permute.xlu0 %783 }
 0x1c6   : > { %v788_v31 = vpop.permute.xlu1 %787 }
 0x1c7   : > { %v794_v55 = vsel %vm791_vm2, %v788_v31, %v784_v30  ;;  %v792_v58 = vsel %vm791_vm2, %v784_v30, %v788_v31 }
 0x1c8   : > { %v755_v32 = vpop.permute.xlu0 %754  ;;  %v805_v62 = vmul.f32 %v2895_v52, %v794_v55  ;;  %v804_v14 = vmul.f32 %v2892_v51, %v792_v58 }
 0x1ca   : > { %v759_v33 = vpop.permute.xlu1 %758 }
 0x1cb   : > { %v765_v15 = vsel %vm762_vm3, %v759_v33, %v755_v32  ;;  %v763_v18 = vsel %vm762_vm3, %v755_v32, %v759_v33 }
 0x1cc   : > { %v726_v34 = vpop.permute.xlu0 %725  ;;  %v776_v24 = vmul.f32 %v2916_v1, %v765_v15  ;;  %v775_v30 = vmul.f32 %v2913_v63, %v763_v18 }
 0x1ce   : > { %v730_v35 = vpop.permute.xlu1 %729 }
 0x1cf   : > { %v736_v31 = vsel %vm733_vm4, %v730_v35, %v726_v34  ;;  %v734_v39 = vsel %vm733_vm4, %v726_v34, %v730_v35  ;;  %v2956_v34 = vrot.slane %v2886_v48, %v707_v53  ;;  %v2959_v35 = vrot.slane %v2888_v49, %v707_v53 }
 0x1d0   : > { %v2869_v36 = vpop.permute.xlu0 %692 }
 0x1d2   : > { %v2871_v37 = vpop.permute.xlu1 %696 }
 0x1d3   : > { %v701_v58 = vsel %vm700_vm5, %v2869_v36, %v2871_v37 }
 0x1d4   : > { %v2873_v38 = vpop.permute.xlu0 %663 }
 0x1d6   : > { %v2875_v40 = vpop.permute.xlu1 %667 }
 0x1d7   : > { %v674_v18 = vsel %vm671_vm6, %v2875_v40, %v2873_v38 }
 0x1d8   : > { %v2877_v41 = vpop.permute.xlu0 %634 }
 0x1da   : > { %v2881_v43 = vpop.permute.xlu1 %638 }
 0x1dc   : > { %v757_v45 = vpop.permute.xlu0 %756 }
 0x1de   : > { %v786_v47 = vpop.permute.xlu1 %785 }
 0x1e0   : > { %v728_v50 = vpop.permute.xlu0 %727 }
 0x1e2   : > { %v790_v54 = vpop.permute.xlu1 %789 }
 0x1e3   : > { %v793_v56 = vsel %vm791_vm2, %v786_v47, %v790_v54  ;;  %v795_v57 = vsel %vm791_vm2, %v790_v54, %v786_v47  ;;  %v747_v47 = vmul.f32 %v2936_v28, %v736_v31 }
 0x1e4   : > { %v806_v59 = vmul.f32 %v2892_v51, %v793_v56  ;;  %v807_v60 = vmul.f32 %v2895_v52, %v795_v57  ;;  %v2909_v61 = vpop.permute.xlu0 %603  ;;  %v678_v56 = vsub.s32 2, %v2879_v42 }
 0x1e6   : > { %896 = vmatprep.subr.mxu1 %v807_v60  ;;  %v761_v13 = vpop.permute.xlu1 %760  ;;  %v2986_v15 = vrot.slane %v2888_v49, %v678_v56 }
 0x1e7   : > { %v764_v16 = vsel %vm762_vm3, %v757_v45, %v761_v13  ;;  %v766_v17 = vsel %vm762_vm3, %v761_v13, %v757_v45  ;;  %897 = vmatpush1.msra.mxu1 %v806_v59 }
 0x1e8   : > { %v777_v20 = vmul.f32 %v2913_v63, %v764_v16  ;;  %v778_v22 = vmul.f32 %v2916_v1, %v766_v17  ;;  %898 = vmatprep.subr.mxu1 %v805_v62  ;;  %v695_v23 = vpop.permute.xlu0 %694  ;;  %v703_v62 = vsel %vm700_vm5, %v2871_v37, %v2869_v36  ;;  %v649_v36 = vsub.s32 1, %v2879_v42 }
 0x1e9   : > { %899 = vmatpush1.msra.mxu1 %v804_v14  ;;  %v714_v14 = vmul.f32 %v2959_v35, %v701_v58  ;;  %v713_v16 = vmul.f32 %v2956_v34, %v703_v62  ;;  %v3054_v62 = vld [vmem:[#allocation3 + $0x18] ss:$0 sm:$0xff] }
 0x1ea   : > { %v732_v29 = vpop.permute.xlu1 %731  ;;  %900 = vmatprep.subr.mxu1 %v778_v22 }
 0x1eb   : > { %v735_v32 = vsel %vm733_vm4, %v728_v50, %v732_v29  ;;  %v737_v33 = vsel %vm733_vm4, %v732_v29, %v728_v50  ;;  %901 = vmatpush1.msra.mxu1 %v777_v20  ;;  %v746_v50 = vmul.f32 %v2933_v26, %v734_v39  ;;  %v3010_v29 = vrot.slane %v2888_v49, %v649_v36 }
 0x1ec   : > { %v748_v45 = vmul.f32 %v2933_v26, %v735_v32  ;;  %v749_v46 = vmul.f32 %v2936_v28, %v737_v33  ;;  %902 = vmatprep.subr.mxu1 %v776_v24  ;;  %v666_v54 = vpop.permute.xlu0 %665  ;;  %v3007_v24 = vrot.slane %v2886_v48, %v649_v36  ;;  %v643_v32 = vsel %vm642_vm7, %v2877_v41, %v2881_v43 }
 0x1ed   : > { %903 = vmatpush1.msra.mxu1 %v775_v30  ;;  %v620_v30 = vsub.s32 0, %v2879_v42  ;;  %v645_v42 = vsel %vm642_vm7, %v2881_v43, %v2877_v41 }
 0x1ee   : > { %v2951_v55 = vpop.permute.xlu1 %607  ;;  %904 = vmatprep.subr.mxu1 %v749_v46  ;;  %v655_v41 = vmul.f32 %v3007_v24, %v645_v42 }
 0x1ef   : > { %905 = vmatpush1.msra.mxu1 %v748_v45  ;;  %v3031_v53 = vrot.slane %v2886_v48, %v620_v30  ;;  %v614_v43 = vsel %vm613_vm8, %v2909_v61, %v2951_v55 }
 0x1f0   : > { %906 = vmatprep.subr.mxu1 %v747_v47  ;;  %v656_v47 = vmul.f32 %v3010_v29, %v643_v32 }
 0x1f1   : > { %907 = vmatpush1.msra.mxu1 %v746_v50 }
 0x1f2   : > { %v699_v57 = vpop.permute.xlu1 %698  ;;  %908 = vmatprep.subr.mxu1 %v2828_v27  ;;  %v637_v27 = vpop.permute.xlu0 %636 }
 0x1f3   : > { %v702_v59 = vsel %vm700_vm5, %v695_v23, %v699_v57  ;;  %v704_v60 = vsel %vm700_vm5, %v699_v57, %v695_v23  ;;  %909 = vmatpush1.msra.mxu1 %v2820_v25  ;;  %v2983_v25 = vrot.slane %v2886_v48, %v678_v56  ;;  %v616_v48 = vsel %vm613_vm8, %v2951_v55, %v2909_v61 }
 0x1f4   : > { %v715_v12 = vmul.f32 %v2956_v34, %v704_v60  ;;  %v716_v13 = vmul.f32 %v2959_v35, %v702_v59  ;;  %910 = vmatprep.subr.mxu1 %v2796_v21  ;;  %v672_v21 = vsel %vm671_vm6, %v2873_v38, %v2875_v40  ;;  %v3052_v60 = vld [vmem:[#allocation3 + $0x10] ss:$0 sm:$0xff] }
 0x1f5   : > { %911 = vmatpush1.msra.mxu1 %v2794_v19  ;;  %v685_v23 = vmul.f32 %v2986_v15, %v672_v21  ;;  %v684_v40 = vmul.f32 %v2983_v25, %v674_v18 }
 0x1f6   : > { %v670_v37 = vpop.permute.xlu1 %669  ;;  %912 = vmatprep.subr.mxu1 %v716_v13  ;;  %v606_v31 = vpop.permute.xlu0 %605  ;;  %v626_v13 = vmul.f32 %v3031_v53, %v616_v48 }
 0x1f7   : > { %v673_v19 = vsel %vm671_vm6, %v666_v54, %v670_v37  ;;  %v675_v17 = vsel %vm671_vm6, %v670_v37, %v666_v54  ;;  %913 = vmatpush1.msra.mxu1 %v715_v12  ;;  %v3034_v54 = vrot.slane %v2888_v49, %v620_v30  ;;  %v3075_v30 = vld [vmem:[%s3471_s10 + $0x18] sm:$0xff] }
 0x1f8   : > { %v686_v20 = vmul.f32 %v2983_v25, %v675_v17  ;;  %v687_v22 = vmul.f32 %v2986_v15, %v673_v19  ;;  %914 = vmatprep.subr.mxu1 %v714_v14 }
 0x1f9   : > { %915 = vmatpush1.msra.mxu1 %v713_v16 }
 0x1fa   : > { %v641_v38 = vpop.permute.xlu1 %640  ;;  %916 = vmatprep.subr.mxu1 %v687_v22  ;;  %v815_v49 = vpop.permute.xlu0 %814  ;;  %v844_v22 = vld [vmem:[#allocation8 + $0x18] sm:$0xff] }
 0x1fb   : > { %v644_v33 = vsel %vm642_vm7, %v637_v27, %v641_v38  ;;  %v646_v39 = vsel %vm642_vm7, %v641_v38, %v637_v27  ;;  %917 = vmatpush1.msra.mxu1 %v686_v20  ;;  %v627_v27 = vmul.f32 %v3034_v54, %v614_v43  ;;  %v841_v20 = vld [vmem:[#allocation8] sm:$0xff]  ;;  %v2526_v38 = vmov 2  }
 0x1fc   : > { %v657_v45 = vmul.f32 %v3007_v24, %v646_v39  ;;  %v658_v46 = vmul.f32 %v3010_v29, %v644_v33  ;;  %918 = vmatprep.subr.mxu1 %v685_v23  ;;  %v843_v23 = vld [vmem:[#allocation8 + $0x10] sm:$0xff]  ;;  %2232 = vset.pattern.permute.xlu1 %v2526_v38 }
 0x1fd   : > { %919 = vmatpush1.msra.mxu1 %v684_v40  ;;  %2233 = vset.pattern.permute.xlu0 %v2526_v38 }
 0x1fe   : > { %v610_v50 = vpop.permute.xlu1 %609  ;;  %920 = vmatprep.subr.mxu1 %v658_v46  ;;  %v813_v37 = vpop.permute.xlu0 %812  ;;  %996 = vperm.xlu1 %2232, %v3075_v30  }
 0x1ff   : > { %v615_v56 = vsel %vm613_vm8, %v606_v31, %v610_v50  ;;  %v617_v57 = vsel %vm613_vm8, %v610_v50, %v606_v31  ;;  %921 = vmatpush1.msra.mxu1 %v657_v45  ;;  %v3080_v31 = vld [vmem:[%s3471_s10 + $0x10] sm:$0xff] }
 0x200   : > { %v628_v58 = vmul.f32 %v3031_v53, %v617_v57  ;;  %v629_v59 = vmul.f32 %v3034_v54, %v615_v56  ;;  %922 = vmatprep.subr.mxu1 %v656_v47  ;;  %991 = vperm.xlu0 %2233, %v3080_v31  }
 0x201   : > { %923 = vmatpush1.msra.mxu1 %v655_v41 }
 0x202   : > { %v819_v12 = vpop.permute.xlu1 %818  ;;  %924 = vmatprep.subr.mxu1 %v629_v59  ;;  %986 = vperm.xlu1 %2232, %v2773_v8   ;;  %v979_v59 = vld [vmem:[%s3465_s4 + $0x10] sm:$0xff] }
 0x203   : > { %v822_v61 = vsel %vm820_vm9, %v815_v49, %v819_v12  ;;  %v824_v55 = vsel %vm820_vm9, %v819_v12, %v815_v49  ;;  %925 = vmatpush1.msra.mxu1 %v628_v58  ;;  %v977_v49 = vld [vmem:[%s3465_s4] sm:$0xff]  ;;  %v978_v58 = vld [vmem:[%s3465_s4 + $0x8] sm:$0xff]  ;;  %v2527_v12 = vmov 3  }
 0x204   : > { %v835_v14 = vmul.f32 %v3052_v60, %v822_v61  ;;  %v836_v36 = vmul.f32 %v3054_v62, %v824_v55  ;;  %926 = vmatprep.subr.mxu1 %v627_v27  ;;  %v980_v27 = vld [vmem:[%s3465_s4 + $0x18] sm:$0xff]  ;;  %2234 = vset.pattern.permute.xlu0 %v2527_v12 }
 0x205   : > { %927 = vmatpush1.msra.mxu1 %v626_v13  ;;  %1123 = vperm.xlu0 %2234, %v2773_v8  }
 0x206   : > { %v817_v16 = vpop.permute.xlu1 %816  ;;  %956 = vmatprep.subr.mxu1 %v836_v36  ;;  %982 = vperm.xlu1 %2232, %v2785_v11  }
 0x207   : > { %v821_v21 = vsel %vm820_vm9, %v813_v37, %v817_v16  ;;  %v823_v19 = vsel %vm820_vm9, %v817_v16, %v813_v37  ;;  %957 = vmatpush2.msra.mxu1 %v835_v14 }
 0x208   : > { %v833_v17 = vmul.f32 %v3052_v60, %v821_v21  ;;  %v834_v18 = vmul.f32 %v3054_v62, %v823_v19 }
 0x209   : > { %v887_v33 = vpop.permute.xlu0 %886 }
 0x20a   : > { %958 = vmatprep.subr.mxu1 %v834_v18  ;;  %2235 = vset.pattern.permute.xlu1 %v2527_v12 }
 0x20b   : > { %959 = vmatpush2.msra.mxu1 %v833_v17  ;;  %1119 = vperm.xlu1 %2235, %v2785_v11  }
 0x20c   : > { %961 = vmatmul.mubr.f32.vlgmr.msra.gmra.mxu1 %v841_v20 }
 0x20d   : > { %2070 = vmatprep.mubr.msk.f32.mxu1 %vm889_vm1, %v844_v22 }
 0x210   : > { %967 = vmatmul.mubr.f32.gmra.mxu1 %v843_v23 }
 0x211   : > { %1608 = vmatprep.mubr.f32.mxu1 %v2515_v0 }
 0x213   : > { %v883_v42 = vpop.permute.xlu1 %882 }
 0x279   : > { %v997_v55 = vpop.permute.xlu1 %996 }
 0x27b   : > { %v992_v19 = vpop.permute.xlu0 %991 }
 0x27d   : > { %v987_v16 = vpop.permute.xlu1 %986 }
 0x281   : > { %v983_v38 = vpop.permute.xlu1 %982 }
 0x2cc   : > { %v962_v40 = vpop.f32.mrf.mxu1 }
 0x2cd   : > { %v963_v41 = vadd.f32 %v962_v40, %v883_v42 }
 0x2ce   : > { %v964_v32 = vpop.f32.mrf.mxu1 }
 0x2cf   : > { %v965_v47 = vadd.f32 %v964_v32, %v883_v42  ;;  %v973_v48 = vmax.f32 %v963_v41, 0.0 }
 0x2d0   : > { %v968_v39 = vpop.f32.mrf.mxu1 }
 0x2d1   : > { %v969_v45 = vadd.f32 %v968_v39, %v887_v33  ;;  %v974_v57 = vmax.f32 %v965_v47, 0.0 }
 0x2d2   : > { %v970_v46 = vpop.f32.mrf.mxu1 }
 0x2d3   : > { %v971_v50 = vadd.f32 %v970_v46, %v887_v33  ;;  %v975_v56 = vmax.f32 %v969_v45, 0.0 }
 0x2d5   : > { %v976_v43 = vmax.f32 %v971_v50, 0.0 }
 0x2d7   : > { %1039 = vmatprep.subr.mxu0 %v976_v43 }
 0x2d8   : > { %1040 = vmatpush1.msra.mxu0 %v975_v56 }
 0x2d9   : > { %1041 = vmatprep.subr.mxu0 %v974_v57 }
 0x2da   : > { %1042 = vmatpush1.msra.mxu0 %v973_v48 }
 0x2db   : > { %2071 = vmatmul.mubr.msk.f32.vlgmr.msra.gmra.mxu0 %vm889_vm1, %v977_v49 }
 0x2dc   : > { %1081 = vmatprep.mubr.f32.mxu0 %v2515_v0 }
 0x2df   : > { %2072 = vmatmul.mubr.msk.f32.gmra.mxu0 %vm889_vm1, %v978_v58  ;;  %v1120_v58 = vpop.permute.xlu1 %1119 }
 0x2e0   : > { %1087 = vmatprep.mubr.f32.mxu0 %v2515_v0 }
 0x2e3   : > { %2073 = vmatmul.mubr.msk.f32.gmra.mxu0 %vm889_vm1, %v979_v59 }
 0x2e4   : > { %1093 = vmatprep.mubr.f32.mxu0 %v2515_v0 }
 0x2e7   : > { %2074 = vmatmul.mubr.msk.f32.gmra.mxu0 %vm889_vm1, %v980_v27 }
 0x2e8   : > { %1196 = vmatprep.mubr.f32.mxu0 %v2515_v0 }
 0x39b   : > { %v1077_v13 = vpop.f32.mrf.mxu0 }
 0x39c   : > { %v1078_v47 = vadd.f32 %v1077_v13, %v983_v38 }
 0x39d   : > { %v1079_v61 = vpop.f32.mrf.mxu0 }
 0x39e   : > { %v1080_v42 = vadd.f32 %v1079_v61, %v983_v38 }
 0x39f   : > { %v1083_v14 = vpop.f32.mrf.mxu0 }
 0x3a0   : > { %v1084_v33 = vadd.f32 %v1083_v14, %v987_v16  ;;  %v1101_v48 = vadd.f32 %v1080_v42, %v2776_v9  ;;  %v1116_v9 = vld [vmem:[#allocation9] sm:$0xff] }
 0x3a1   : > { %v1085_v36 = vpop.f32.mrf.mxu0 }
 0x3a2   : > { %v1086_v40 = vadd.f32 %v1085_v36, %v987_v16  ;;  %v1102_v56 = vadd.f32 %v1084_v33, %v2768_v7  ;;  %v1124_v36 = vpop.permute.xlu0 %1123 }
 0x3a3   : > { %v1089_v37 = vpop.f32.mrf.mxu0 }
 0x3a4   : > { %v1090_v22 = vadd.f32 %v1089_v37, %v992_v19  ;;  %v1103_v41 = vadd.f32 %v1086_v40, %v2765_v6  ;;  %v3132_v6 = vmax.f32 %v1101_v48, 0.0 }
 0x3a5   : > { %v1091_v21 = vpop.f32.mrf.mxu0 }
 0x3a6   : > { %v1092_v18 = vadd.f32 %v1091_v21, %v992_v19  ;;  %v1104_v50 = vadd.f32 %v1090_v22, %v2762_v5  ;;  %v3129_v5 = vmax.f32 %v1102_v56, 0.0 }
 0x3a7   : > { %v1095_v17 = vpop.f32.mrf.mxu0 }
 0x3a8   : > { %v1096_v20 = vadd.f32 %v1095_v17, %v997_v55  ;;  %v1105_v45 = vadd.f32 %v1092_v18, %v2759_v4  ;;  %v3126_v4 = vmax.f32 %v1103_v41, 0.0  ;;  %v1378_v18 = vld [vmem:[#allocation11 + $0x8] sm:$0xff] }
 0x3a9   : > { %v1097_v23 = vpop.f32.mrf.mxu0 }
 0x3aa   : > { %v1098_v32 = vadd.f32 %v1097_v23, %v997_v55  ;;  %v1106_v39 = vadd.f32 %v1096_v20, %v2757_v3  ;;  %v3119_v49 = vmax.f32 %v1105_v45, 0.0  ;;  %v1100_v3 = vadd.f32 %v1078_v47, %v2780_v10  ;;  %v1117_v10 = vld [vmem:[#allocation9 + $0x8] sm:$0xff] }
 0x3ab   : > { %v2528_v20 = vmov 4  }
 0x3ac   : > { %v1107_v46 = vadd.f32 %v1098_v32, %v2755_v2  ;;  %v3116_v57 = vmax.f32 %v1106_v39, 0.0  ;;  %v3123_v2 = vmax.f32 %v1104_v50, 0.0  ;;  %v3135_v7 = vmax.f32 %v1100_v3, 0.0  ;;  %2237 = vset.pattern.permute.xlu0 %v2528_v20  ;;  %2236 = vset.pattern.permute.xlu1 %v2528_v20 }
 0x3ae   : > { %v3113_v43 = vmax.f32 %v1107_v46, 0.0 }
 0x3b0   : > { %1156 = vmatprep.subr.mxu0 %v3113_v43 }
 0x3b1   : > { %1157 = vmatpush1.msra.mxu0 %v3116_v57 }
 0x3b2   : > { %1158 = vmatprep.subr.mxu0 %v3119_v49 }
 0x3b3   : > { %1159 = vmatpush1.msra.mxu0 %v3123_v2 }
 0x3b4   : > { %1160 = vmatprep.subr.mxu0 %v3126_v4 }
 0x3b5   : > { %1161 = vmatpush1.msra.mxu0 %v3129_v5 }
 0x3b6   : > { %1162 = vmatprep.subr.mxu0 %v3132_v6 }
 0x3b7   : > { %1163 = vmatpush1.msra.mxu0 %v3135_v7 }
 0x3b8   : > { %2075 = vmatmul.mubr.msk.f32.vlgmr.msra.gmra.mxu0 %vm515_vm0, %v1116_v9 }
 0x3b9   : > { %1202 = vmatprep.mubr.f32.mxu0 %v2515_v0 }
 0x3bc   : > { %2076 = vmatmul.mubr.msk.f32.gmra.mxu0 %vm515_vm0, %v1117_v10 }
 0x3bd   : > { %2077 = vmatprep.mubr.msk.f32.mxu0 %vm889_vm1, %v1378_v18 }
 0x478   : > { %v1198_v59 = vpop.f32.mrf.mxu0 }
 0x479   : > { %v1199_v27 = vadd.f32 %v1198_v59, %v1120_v58 }
 0x47a   : > { %v1200_v12 = vpop.f32.mrf.mxu0 }
 0x47b   : > { %v3143_v13 = vmax.f32 %v1199_v27, 0.0  ;;  %v1201_v61 = vadd.f32 %v1200_v12, %v1120_v58 }
 0x47c   : > { %v1204_v14 = vpop.f32.mrf.mxu0 }
 0x47d   : > { %v3145_v55 = vmax.f32 %v1201_v61, 0.0  ;;  %1337 = vrot.lane.b32.xlu1 %v3143_v13, %s2517_s22  ;;  %v1205_v37 = vadd.f32 %v1204_v14, %v1124_v36 }
 0x47e   : > { %v1206_v16 = vpop.f32.mrf.mxu0 }
 0x47f   : > { %1341 = vrot.lane.b32.xlu0 %v3145_v55, %s2517_s22  ;;  %v3167_v21 = vmax.f32 %v1205_v37, 0.0  ;;  %v1207_v19 = vadd.f32 %v1206_v16, %v1124_v36 }
 0x481   : > { %1317 = vrot.lane.b32.xlu1 %v3143_v13, %s2518_s30  ;;  %v3173_v17 = vmax.f32 %v1207_v19, 0.0 }
 0x483   : > { %1321 = vrot.lane.b32.xlu0 %v3145_v55, %s2518_s30 }
 0x485   : > { %1297 = vrot.lane.b32.xlu1 %v3143_v13, %s2519_s19 }
 0x487   : > { %1301 = vrot.lane.b32.xlu0 %v3145_v55, %s2519_s19 }
 0x489   : > { %1273 = vrot.lane.b32.xlu1 %v3143_v13, %s2520_s14 }
 0x48b   : > { %1277 = vrot.lane.b32.xlu0 %v3145_v55, %s2520_s14 }
 0x48d   : > { %1253 = vrot.lane.b32.xlu1 %v3143_v13, %s2521_s29 }
 0x48f   : > { %1257 = vrot.lane.b32.xlu0 %v3145_v55, %s2521_s29 }
 0x491   : > { %1233 = vrot.lane.b32.xlu1 %v3143_v13, %s2522_s13 }
 0x493   : > { %1237 = vrot.lane.b32.xlu0 %v3145_v55, %s2522_s13 }
 0x495   : > { %1339 = vrot.lane.b32.xlu1 %v3167_v21, %s2517_s22 }
 0x497   : > { %1343 = vrot.lane.b32.xlu0 %v3173_v17, %s2517_s22  ;;  %s3499_s22 = smov 111  }
 0x499   : > { %1319 = vrot.lane.b32.xlu1 %v3167_v21, %s2518_s30 }
 0x49b   : > { %1323 = vrot.lane.b32.xlu0 %v3173_v17, %s2518_s30  ;;  %s479_s30 = sand.u32 1, %s2494_s18  }
 0x49c   : > { %s3420_s16 = scalar_lea.sflag [#allocation5], %s479_s30 }
 0x49d   : > { %1299 = vrot.lane.b32.xlu1 %v3167_v21, %s2519_s19 }
 0x49f   : > { %1303 = vrot.lane.b32.xlu0 %v3173_v17, %s2519_s19  ;;  %s2062_s19 = sshll.u32 %s479_s30, 6 }
 0x4a1   : > { %1213 = vrot.lane.b32.xlu1 %v3143_v13, %s2523_s24 }
 0x4a3   : > { %1217 = vrot.lane.b32.xlu0 %v3145_v55, %s2523_s24 }
 0x4a5   : > { %1275 = vrot.lane.b32.xlu1 %v3167_v21, %s2520_s14 }
 0x4a7   : > { %1279 = vrot.lane.b32.xlu0 %v3173_v17, %s2520_s14  ;;  %s3399_s14 = scalar_lea.vmem [#allocation15], %s2062_s19 }
 0x4a9   : > { %1255 = vrot.lane.b32.xlu1 %v3167_v21, %s2521_s29 }
 0x4ab   : > { %1259 = vrot.lane.b32.xlu0 %v3173_v17, %s2521_s29  ;;  %s1913_s29 = sshll.u32 %s3399_s14, 4  ;;  %s3409_s29 = int_to_ptr.vmem [resolvable:$true] %s1913_s29 }
 0x4ac   : > { %p2433_p1 = scmp.lt.s32.totalorder %s3409_s29, %s2431_s26 }
 0x4ad   : > { %1235 = vrot.lane.b32.xlu1 %v3167_v21, %s2522_s13 }
 0x4af   : > { %1239 = vrot.lane.b32.xlu0 %v3173_v17, %s2522_s13 }
 0x4b1   : > { %1215 = vrot.lane.b32.xlu1 %v3167_v21, %s2523_s24 }
 0x4b3   : > { %1219 = vrot.lane.b32.xlu0 %v3173_v17, %s2523_s24  ;;  %s2097_s24 = sshll.u32 %s2614_s21, 10  ;;  %s2426_s21 = scalar_lea.vmem %s3409_s29, 1024 }
 0x4b4   : > { %s3415_s12 = scalar_lea.hbm %s3472_s11, %s2097_s24  ;;  %p2427_p11 = scmp.ne.s32.totalorder %s3409_s29, %s2426_s21 }
 0x4b5   : > { %1359 = vrot.lane.b32.xlu1 %v3167_v21, %s3499_s22 }
 0x4b6   : > { %p2428_p0 = pnand %p2427_p11, %p2631_p5 }
 0x4b7   : > { %1363 = vrot.lane.b32.xlu0 %v3173_v17, %s3499_s22 }
 0x4b8   : > { %p2429_p3 = pneg %p2428_p0 }
 0x4b9   : > { %1357 = vrot.lane.b32.xlu1 %v3143_v13, %s3499_s22 }
 0x4bb   : > { %1361 = vrot.lane.b32.xlu0 %v3145_v55, %s3499_s22  ;;  %s2432_s22 = scalar_lea.vmem %s2431_s26, 2048 }
 0x4bc   : > { %p2434_p13 = scmp.lt.s32.totalorder %s2432_s22, %s2426_s21 }
 0x4bd   : > { %1422 = vperm.xlu1 %2236, %v2773_v8  }
 0x4be   : > { %p2435_p2 = por %p2434_p13, %p2433_p1 }
 0x4bf   : > { %1418 = vperm.xlu0 %2237, %v2785_v11  }
 0x4c0   : > { %p2436_p7 = pnand %p2435_p2, %p2429_p3 }
 0x4ef   : > { %v1338_v22 = vpop.permute.xlu1 %1337 }
 0x4f1   : > { %v1342_v23 = vpop.permute.xlu0 %1341 }
 0x4f2   : > { %v1347_v11 = vsel %vm791_vm2, %v1342_v23, %v1338_v22  ;;  %v1345_v3 = vsel %vm791_vm2, %v1338_v22, %v1342_v23 }
 0x4f3   : > { %v1318_v38 = vpop.permute.xlu1 %1317  ;;  %v1350_v59 = vmul.f32 %v1347_v11, %v2895_v52  ;;  %v1349_v12 = vmul.f32 %v1345_v3, %v2892_v51 }
 0x4f5   : > { %v1322_v40 = vpop.permute.xlu0 %1321 }
 0x4f6   : > { %v1327_v61 = vsel %vm762_vm3, %v1322_v40, %v1318_v38  ;;  %v1325_v37 = vsel %vm762_vm3, %v1318_v38, %v1322_v40 }
 0x4f7   : > { %v1298_v32 = vpop.permute.xlu1 %1297  ;;  %v1329_v20 = vmul.f32 %v1325_v37, %v2913_v63 }
 0x4f9   : > { %v1302_v33 = vpop.permute.xlu0 %1301 }
 0x4fa   : > { %v1307_v22 = vsel %vm733_vm4, %v1302_v33, %v1298_v32  ;;  %v1305_v40 = vsel %vm733_vm4, %v1298_v32, %v1302_v33 }
 0x4fb   : > { %v1274_v39 = vpop.permute.xlu1 %1273 }
 0x4fd   : > { %v1278_v42 = vpop.permute.xlu0 %1277 }
 0x4fe   : > { %v1281_v33 = vsel %vm700_vm5, %v1274_v39, %v1278_v42 }
 0x4ff   : > { %v3218_v45 = vpop.permute.xlu1 %1253 }
 0x501   : > { %v3220_v46 = vpop.permute.xlu0 %1257 }
 0x503   : > { %v3222_v47 = vpop.permute.xlu1 %1233 }
 0x505   : > { %v3224_v50 = vpop.permute.xlu0 %1237 }
 0x507   : > { %v1340_v41 = vpop.permute.xlu1 %1339 }
 0x509   : > { %v1344_v8 = vpop.permute.xlu0 %1343 }
 0x50a   : > { %v1346_v56 = vsel %vm791_vm2, %v1340_v41, %v1344_v8  ;;  %v1348_v48 = vsel %vm791_vm2, %v1344_v8, %v1340_v41 }
 0x50b   : > { %v1351_v9 = vmul.f32 %v1346_v56, %v2892_v51  ;;  %v1352_v10 = vmul.f32 %v1348_v48, %v2895_v52  ;;  %v1320_v58 = vpop.permute.xlu1 %1319  ;;  %v1330_v51 = vmul.f32 %v1327_v61, %v2916_v1  ;;  %v1309_v56 = vmul.f32 %v1305_v40, %v2933_v26 }
 0x50d   : > { %1431 = vmatprep.subr.mxu0 %v1352_v10  ;;  %v1324_v27 = vpop.permute.xlu0 %1323 }
 0x50e   : > { %v1326_v14 = vsel %vm762_vm3, %v1320_v58, %v1324_v27  ;;  %v1328_v36 = vsel %vm762_vm3, %v1324_v27, %v1320_v58  ;;  %1432 = vmatpush1.msra.mxu0 %v1351_v9  ;;  %v1286_v58 = vmul.f32 %v1281_v33, %v2959_v35  ;;  %v1377_v33 = vld [vmem:[#allocation11] sm:$0xff] }
 0x50f   : > { %v1331_v16 = vmul.f32 %v1326_v14, %v2913_v63  ;;  %v1332_v52 = vmul.f32 %v1328_v36, %v2916_v1  ;;  %v1300_v19 = vpop.permute.xlu1 %1299  ;;  %1433 = vmatprep.subr.mxu0 %v1350_v59  ;;  %v1310_v63 = vmul.f32 %v1307_v22, %v2936_v28  ;;  %v1241_v36 = vsel %vm642_vm7, %v3222_v47, %v3224_v50 }
 0x510   : > { %1434 = vmatpush1.msra.mxu0 %v1349_v12 }
 0x511   : > { %1435 = vmatprep.subr.mxu0 %v1332_v52  ;;  %v1304_v18 = vpop.permute.xlu0 %1303  ;;  %v1246_v52 = vmul.f32 %v1241_v36, %v3010_v29  ;;  %v1515_v36 = vld [vmem:[%s3468_s7 + $0x18] sm:$0xff] }
 0x512   : > { %v1306_v23 = vsel %vm733_vm4, %v1300_v19, %v1304_v18  ;;  %v1308_v38 = vsel %vm733_vm4, %v1304_v18, %v1300_v19  ;;  %1436 = vmatpush1.msra.mxu0 %v1331_v16 }
 0x513   : > { %v1311_v41 = vmul.f32 %v1306_v23, %v2933_v26  ;;  %v1312_v1 = vmul.f32 %v1308_v38, %v2936_v28  ;;  %v1214_v8 = vpop.permute.xlu1 %1213  ;;  %1437 = vmatprep.subr.mxu0 %v1330_v51  ;;  %v1283_v26 = vsel %vm700_vm5, %v1278_v42, %v1274_v39 }
 0x514   : > { %1438 = vmatpush1.msra.mxu0 %v1329_v20  ;;  %v1285_v27 = vmul.f32 %v1283_v26, %v2956_v34  ;;  %v2529_v26 = vmov 5  }
 0x515   : > { %1439 = vmatprep.subr.mxu0 %v1312_v1  ;;  %v1218_v11 = vpop.permute.xlu0 %1217  ;;  %2238 = vset.pattern.permute.xlu1 %v2529_v26 }
 0x516   : > { %1440 = vmatpush1.msra.mxu0 %v1311_v41  ;;  %v1221_v18 = vsel %vm613_vm8, %v1214_v8, %v1218_v11  ;;  %2239 = vset.pattern.permute.xlu0 %v2529_v26 }
 0x517   : > { %v1276_v48 = vpop.permute.xlu1 %1275  ;;  %1441 = vmatprep.subr.mxu0 %v1310_v63  ;;  %1529 = vperm.xlu1 %2238, %v3075_v30  }
 0x518   : > { %1442 = vmatpush1.msra.mxu0 %v1309_v56  ;;  %1521 = vperm.xlu0 %2239, %v2242_v44  }
 0x519   : > { %1443 = vmatprep.subr.mxu0 %v3173_v17  ;;  %v1280_v32 = vpop.permute.xlu0 %1279 }
 0x51a   : > { %v1282_v3 = vsel %vm700_vm5, %v1276_v48, %v1280_v32  ;;  %v1284_v28 = vsel %vm700_vm5, %v1280_v32, %v1276_v48  ;;  %1444 = vmatpush1.msra.mxu0 %v3167_v21  ;;  %v1261_v21 = vsel %vm671_vm6, %v3218_v45, %v3220_v46 }
 0x51b   : > { %v1287_v9 = vmul.f32 %v1284_v28, %v2956_v34  ;;  %v1288_v10 = vmul.f32 %v1282_v3, %v2959_v35  ;;  %v1256_v17 = vpop.permute.xlu1 %1255  ;;  %1445 = vmatprep.subr.mxu0 %v3145_v55  ;;  %v1263_v35 = vsel %vm671_vm6, %v3220_v46, %v3218_v45  ;;  %v1266_v12 = vmul.f32 %v1261_v21, %v2986_v15  ;;  %v1380_v3 = vld [vmem:[#allocation11 + $0x18] sm:$0xff]  ;;  %v1379_v28 = vld [vmem:[#allocation11 + $0x10] sm:$0xff] }
 0x51c   : > { %1446 = vmatpush1.msra.mxu0 %v3143_v13  ;;  %v1265_v14 = vmul.f32 %v1263_v35, %v2983_v25  ;;  %1525 = vperm.xlu1 %2238, %v3080_v31  }
 0x51d   : > { %1447 = vmatprep.subr.mxu0 %v1288_v10  ;;  %v1260_v59 = vpop.permute.xlu0 %1259 }
 0x51e   : > { %v1262_v39 = vsel %vm671_vm6, %v1256_v17, %v1260_v59  ;;  %v1264_v42 = vsel %vm671_vm6, %v1260_v59, %v1256_v17  ;;  %1448 = vmatpush1.msra.mxu0 %v1287_v9 }
 0x51f   : > { %v1267_v13 = vmul.f32 %v1264_v42, %v2983_v25  ;;  %v1268_v34 = vmul.f32 %v1262_v39, %v2986_v15  ;;  %v1236_v55 = vpop.permute.xlu1 %1235  ;;  %1449 = vmatprep.subr.mxu0 %v1286_v58  ;;  %v1243_v15 = vsel %vm642_vm7, %v3224_v50, %v3222_v47  ;;  %v1223_v50 = vsel %vm613_vm8, %v1218_v11, %v1214_v8 }
 0x520   : > { %1450 = vmatpush1.msra.mxu0 %v1285_v27  ;;  %v1245_v51 = vmul.f32 %v1243_v15, %v3007_v24  ;;  %v1225_v40 = vmul.f32 %v1223_v50, %v3031_v53  ;;  %v1655_v15 = vld [vmem:[#allocation14 + $0x10] sm:$0xff] }
 0x521   : > { %1451 = vmatprep.subr.mxu0 %v1268_v34  ;;  %v1240_v61 = vpop.permute.xlu0 %1239 }
 0x522   : > { %v1242_v45 = vsel %vm642_vm7, %v1236_v55, %v1240_v61  ;;  %v1244_v46 = vsel %vm642_vm7, %v1240_v61, %v1236_v55  ;;  %1452 = vmatpush1.msra.mxu0 %v1267_v13  ;;  %v1513_v61 = vld [vmem:[%s3468_s7 + $0x8] sm:$0xff] }
 0x523   : > { %v1247_v37 = vmul.f32 %v1244_v46, %v3007_v24  ;;  %v1248_v25 = vmul.f32 %v1242_v45, %v3010_v29  ;;  %v1216_v16 = vpop.permute.xlu1 %1215  ;;  %1453 = vmatprep.subr.mxu0 %v1266_v12  ;;  %v1226_v24 = vmul.f32 %v1221_v18, %v3034_v54  ;;  %v1512_v12 = vld [vmem:[%s3468_s7] sm:$0xff]  ;;  %v1654_v46 = vld [vmem:[#allocation14 + $0x8] sm:$0xff] }
 0x524   : > { %1454 = vmatpush1.msra.mxu0 %v1265_v14  ;;  %v1514_v14 = vld [vmem:[%s3468_s7 + $0x10] sm:$0xff]  ;;  %v1653_v45 = vld [vmem:[#allocation14] sm:$0xff] }
 0x525   : > { %1455 = vmatprep.subr.mxu0 %v1248_v25  ;;  %v1220_v19 = vpop.permute.xlu0 %1219  ;;  %v2530_v25 = vmov 6  }
 0x526   : > { %v1222_v20 = vsel %vm613_vm8, %v1216_v16, %v1220_v19  ;;  %v1224_v47 = vsel %vm613_vm8, %v1220_v19, %v1216_v16  ;;  %1456 = vmatpush1.msra.mxu0 %v1247_v37  ;;  %v1656_v37 = vld [vmem:[#allocation14 + $0x18] sm:$0xff]  ;;  %2241 = vset.pattern.permute.xlu0 %v2530_v25 }
 0x527   : > { %v1227_v22 = vmul.f32 %v1224_v47, %v3031_v53  ;;  %v1228_v29 = vmul.f32 %v1222_v20, %v3034_v54  ;;  %v1360_v23 = vpop.permute.xlu1 %1359  ;;  %1457 = vmatprep.subr.mxu0 %v1246_v52  ;;  %1864 = vperm.xlu0 %2241, %v2242_v44  }
 0x528   : > { %1458 = vmatpush1.msra.mxu0 %v1245_v51 }
 0x529   : > { %1459 = vmatprep.subr.mxu0 %v1228_v29  ;;  %v1364_v38 = vpop.permute.xlu0 %1363 }
 0x52a   : > { %v1366_v41 = vsel %vm820_vm9, %v1360_v23, %v1364_v38  ;;  %v1368_v1 = vsel %vm820_vm9, %v1364_v38, %v1360_v23  ;;  %1460 = vmatpush1.msra.mxu0 %v1227_v22 }
 0x52b   : > { %v1371_v8 = vmul.f32 %v3052_v60, %v1366_v41  ;;  %v1372_v63 = vmul.f32 %v3054_v62, %v1368_v1  ;;  %1461 = vmatprep.subr.mxu0 %v1226_v24  ;;  %v1358_v11 = vpop.permute.xlu1 %1357 }
 0x52c   : > { %1462 = vmatpush1.msra.mxu0 %v1225_v40 }
 0x52d   : > { %1491 = vmatprep.subr.mxu0 %v1372_v63  ;;  %v1362_v54 = vpop.permute.xlu0 %1361 }
 0x52e   : > { %v1365_v56 = vsel %vm820_vm9, %v1358_v11, %v1362_v54  ;;  %v1367_v53 = vsel %vm820_vm9, %v1362_v54, %v1358_v11  ;;  %1492 = vmatpush2.msra.mxu0 %v1371_v8 }
 0x52f   : > { %v1369_v48 = vmul.f32 %v3052_v60, %v1365_v56  ;;  %v1370_v32 = vmul.f32 %v3054_v62, %v1367_v53  ;;  %v2243_v60 = vld [vmem:[%s3471_s10] sm:$0xff] }
 0x530   : > { %1517 = vperm.xlu1 %2238, %v2243_v60  }
 0x531   : > { %1493 = vmatprep.subr.mxu0 %v1370_v32 }
 0x532   : > { %1494 = vmatpush2.msra.mxu0 %v1369_v48 }
 0x533   : > { %1496 = vmatmul.mubr.f32.vlgmr.msra.gmra.mxu0 %v1377_v33 }
 0x534   : > { %2078 = vmatprep.mubr.msk.f32.mxu0 %vm889_vm1, %v1380_v3  ;;  %2240 = vset.pattern.permute.xlu1 %v2530_v25 }
 0x535   : > { %1860 = vperm.xlu1 %2240, %v2243_v60  }
 0x537   : > { %1502 = vmatmul.mubr.f32.gmra.mxu0 %v1379_v28 }
 0x538   : > { %1834 = vmatprep.mubr.f32.mxu0 %v2515_v0  ;;  %v1423_v10 = vpop.permute.xlu1 %1422 }
 0x539   : > { %1868 = vperm.xlu1 %2240, %v3080_v31  }
 0x53a   : > { %v1419_v58 = vpop.permute.xlu0 %1418 }
 0x53d   : > { %1872 = vperm.xlu1 %2240, %v3075_v30  }
 0x592   : > { %v1530_v19 = vpop.permute.xlu1 %1529 }
 0x593   : > { %v1522_v29 = vpop.permute.xlu0 %1521 }
 0x597   : > { %v1526_v47 = vpop.permute.xlu1 %1525 }
 0x5ab   : > { %v1518_v41 = vpop.permute.xlu1 %1517 }
 0x5f3   : > { %v1497_v62 = vpop.f32.mrf.mxu0 }
 0x5f4   : > { %v1498_v42 = vadd.f32 %v1497_v62, %v1419_v58 }
 0x5f5   : > { %v1499_v9 = vpop.f32.mrf.mxu0 }
 0x5f6   : > { %v1500_v21 = vadd.f32 %v1499_v9, %v1419_v58  ;;  %v1508_v55 = vmax.f32 %v1498_v42, 0.0 }
 0x5f7   : > { %v1503_v17 = vpop.f32.mrf.mxu0 }
 0x5f8   : > { %v1504_v59 = vadd.f32 %v1503_v17, %v1423_v10  ;;  %v1509_v34 = vmax.f32 %v1500_v21, 0.0 }
 0x5f9   : > { %v1505_v27 = vpop.f32.mrf.mxu0 }
 0x5fa   : > { %v1506_v39 = vadd.f32 %v1505_v27, %v1423_v10  ;;  %v1510_v13 = vmax.f32 %v1504_v59, 0.0  ;;  %v1861_v27 = vpop.permute.xlu1 %1860 }
 0x5fc   : > { %v1511_v35 = vmax.f32 %v1506_v39, 0.0 }
 0x5fe   : > { %1572 = vmatprep.subr.mxu1 %v1511_v35 }
 0x5ff   : > { %1573 = vmatpush1.msra.mxu1 %v1510_v13 }
 0x600   : > { %1574 = vmatprep.subr.mxu1 %v1509_v34  ;;  %v1865_v34 = vpop.permute.xlu0 %1864 }
 0x601   : > { %1575 = vmatpush1.msra.mxu1 %v1508_v55 }
 0x602   : > { %2079 = vmatmul.mubr.msk.f32.vlgmr.msra.gmra.mxu1 %vm889_vm1, %v1512_v12  ;;  %1693 = vmatprep.subr.mxu1 %v3113_v43 }
 0x603   : > { %1694 = vmatpush1.msra.mxu1 %v3116_v57  ;;  %1614 = vmatprep.mubr.f32.mxu1 %v2515_v0 }
 0x604   : > { %1695 = vmatprep.subr.mxu1 %v3119_v49 }
 0x605   : > { %1696 = vmatpush1.msra.mxu1 %v3123_v2 }
 0x606   : > { %2080 = vmatmul.mubr.msk.f32.gmra.mxu1 %vm889_vm1, %v1513_v61  ;;  %1697 = vmatprep.subr.mxu1 %v3126_v4 }
 0x607   : > { %1698 = vmatpush1.msra.mxu1 %v3129_v5  ;;  %1620 = vmatprep.mubr.f32.mxu1 %v2515_v0 }
 0x608   : > { %1699 = vmatprep.subr.mxu1 %v3132_v6 }
 0x609   : > { %1700 = vmatpush1.msra.mxu1 %v3135_v7 }
 0x60a   : > { %2081 = vmatmul.mubr.msk.f32.gmra.mxu1 %vm889_vm1, %v1514_v14 }
 0x60b   : > { %1626 = vmatprep.mubr.f32.mxu1 %v2515_v0 }
 0x60e   : > { %2082 = vmatmul.mubr.msk.f32.gmra.mxu1 %vm889_vm1, %v1515_v36 }
 0x60f   : > { %1733 = vmatprep.mubr.f32.mxu1 %v2515_v0 }
 0x612   : > { %2083 = vmatmul.mubr.msk.f32.vlgmr.msra.gmra.mxu1 %vm515_vm0, %v1653_v45 }
 0x613   : > { %1739 = vmatprep.mubr.f32.mxu1 %v2515_v0 }
 0x616   : > { %2084 = vmatmul.mubr.msk.f32.gmra.mxu1 %vm515_vm0, %v1654_v46  ;;  %v1869_v46 = vpop.permute.xlu1 %1868 }
 0x617   : > { %1745 = vmatprep.mubr.f32.mxu1 %v2515_v0 }
 0x61a   : > { %2085 = vmatmul.mubr.msk.f32.gmra.mxu1 %vm515_vm0, %v1655_v15 }
 0x61b   : > { %1751 = vmatprep.mubr.f32.mxu1 %v2515_v0 }
 0x61e   : > { %2086 = vmatmul.mubr.msk.f32.gmra.mxu1 %vm515_vm0, %v1656_v37 }
 0x6c2   : > { %v1610_v16 = vpop.f32.mrf.mxu1 }
 0x6c3   : > { %v1611_v56 = vadd.f32 %v1610_v16, %v1518_v41 }
 0x6c4   : > { %v1612_v52 = vpop.f32.mrf.mxu1 }
 0x6c5   : > { %v1613_v63 = vadd.f32 %v1612_v52, %v1518_v41 }
 0x6c6   : > { %v1616_v51 = vpop.f32.mrf.mxu1 }
 0x6c7   : > { %v1617_v31 = vadd.f32 %v1616_v51, %v1522_v29  ;;  %v1634_v28 = vadd.f32 %v1613_v63, %v3132_v6  ;;  %v1651_v6 = vld [vmem:[#allocation12 + $0x10] sm:$0xff] }
 0x6c8   : > { %v1618_v18 = vpop.f32.mrf.mxu1 }
 0x6c9   : > { %v1619_v1 = vadd.f32 %v1618_v18, %v1522_v29  ;;  %v1635_v33 = vadd.f32 %v1617_v31, %v3129_v5  ;;  %v1642_v60 = vmax.f32 %v1634_v28, 0.0  ;;  %v1650_v5 = vld [vmem:[#allocation12 + $0x8] sm:$0xff] }
 0x6ca   : > { %v1622_v20 = vpop.f32.mrf.mxu1 }
 0x6cb   : > { %v1623_v38 = vadd.f32 %v1622_v20, %v1526_v47  ;;  %v1636_v48 = vadd.f32 %v1619_v1, %v3126_v4  ;;  %v1649_v4 = vld [vmem:[#allocation12] sm:$0xff] }
 0x6cc   : > { %v1624_v50 = vpop.f32.mrf.mxu1 }
 0x6cd   : > { %v1625_v23 = vadd.f32 %v1624_v50, %v1526_v47  ;;  %v1637_v53 = vadd.f32 %v1623_v38, %v3123_v2 }
 0x6ce   : > { %v1628_v22 = vpop.f32.mrf.mxu1 }
 0x6cf   : > { %v1629_v24 = vadd.f32 %v1628_v22, %v1530_v19  ;;  %v1638_v11 = vadd.f32 %v1625_v23, %v3119_v49  ;;  %v1645_v44 = vmax.f32 %v1637_v53, 0.0  ;;  %v1644_v49 = vmax.f32 %v1636_v48, 0.0 }
 0x6d0   : > { %v1630_v40 = vpop.f32.mrf.mxu1 }
 0x6d1   : > { %v1631_v8 = vadd.f32 %v1630_v40, %v1530_v19  ;;  %v1639_v30 = vadd.f32 %v1629_v24, %v3116_v57  ;;  %v1646_v26 = vmax.f32 %v1638_v11, 0.0  ;;  %v1633_v57 = vadd.f32 %v1611_v56, %v3135_v7  ;;  %v1652_v7 = vld [vmem:[#allocation12 + $0x18] sm:$0xff]  ;;  %v1873_v24 = vpop.permute.xlu1 %1872 }
 0x6d2   : > { %v1735_v62 = vpop.f32.mrf.mxu1 }
 0x6d3   : > { %v1640_v54 = vadd.f32 %v1631_v8, %v3113_v43  ;;  %v1647_v3 = vmax.f32 %v1639_v30, 0.0  ;;  %v1643_v43 = vmax.f32 %v1635_v33, 0.0  ;;  %v1641_v2 = vmax.f32 %v1633_v57, 0.0 }
 0x6d4   : > { %v1737_v9 = vpop.f32.mrf.mxu1 }
 0x6d5   : > { %v1648_v32 = vmax.f32 %v1640_v54, 0.0 }
 0x6d6   : > { %v1741_v10 = vpop.f32.mrf.mxu1 }
 0x6d7   : > { %1794 = vmatprep.subr.mxu0 %v1648_v32 }
 0x6d8   : > { %1795 = vmatpush1.msra.mxu0 %v1647_v3  ;;  %v1743_v17 = vpop.f32.mrf.mxu1 }
 0x6d9   : > { %1796 = vmatprep.subr.mxu0 %v1646_v26 }
 0x6da   : > { %1797 = vmatpush1.msra.mxu0 %v1645_v44  ;;  %v1747_v39 = vpop.f32.mrf.mxu1 }
 0x6db   : > { %1798 = vmatprep.subr.mxu0 %v1644_v49 }
 0x6dc   : > { %1799 = vmatpush1.msra.mxu0 %v1643_v43  ;;  %v1749_v14 = vpop.f32.mrf.mxu1 }
 0x6dd   : > { %1800 = vmatprep.subr.mxu0 %v1642_v60 }
 0x6de   : > { %1801 = vmatpush1.msra.mxu0 %v1641_v2  ;;  %v1753_v51 = vpop.f32.mrf.mxu1 }
 0x6df   : > { %2087 = vmatmul.mubr.msk.f32.vlgmr.msra.gmra.mxu0 %vm515_vm0, %v1649_v4 }
 0x6e0   : > { %1840 = vmatprep.mubr.f32.mxu0 %v2515_v0  ;;  %v1755_v38 = vpop.f32.mrf.mxu1 }
 0x6e3   : > { %2088 = vmatmul.mubr.msk.f32.gmra.mxu0 %vm515_vm0, %v1650_v5 }
 0x6e4   : > { %1846 = vmatprep.mubr.f32.mxu0 %v2515_v0 }
 0x6e7   : > { %2089 = vmatmul.mubr.msk.f32.gmra.mxu0 %vm515_vm0, %v1651_v6 }
 0x6e8   : > { %1852 = vmatprep.mubr.f32.mxu0 %v2515_v0 }
 0x6eb   : > { %2090 = vmatmul.mubr.msk.f32.gmra.mxu0 %vm515_vm0, %v1652_v7 }
 0x79f   : > { %v1836_v58 = vpop.f32.mrf.mxu0 }
 0x7a0   : > { %v1837_v59 = vadd.f32 %v1836_v58, %v1735_v62 }
 0x7a1   : > { %v1838_v21 = vpop.f32.mrf.mxu0 }
 0x7a2   : > { %v1839_v42 = vadd.f32 %v1838_v21, %v1737_v9  ;;  %v1875_v35 = vadd.f32 %v1861_v27, %v1837_v59 }
 0x7a3   : > { %v1842_v13 = vpop.f32.mrf.mxu0 }
 0x7a4   : > { %v1843_v0 = vadd.f32 %v1842_v13, %v1741_v10  ;;  %v1876_v55 = vadd.f32 %v1861_v27, %v1839_v42  ;;  %v1883_v12 = vmax.f32 %v1875_v35, 0.0 }
 0x7a5   : > { %v1844_v61 = vpop.f32.mrf.mxu0 }
 0x7a6   : > { %v1845_v36 = vadd.f32 %v1844_v61, %v1743_v17  ;;  %v1884_v45 = vmax.f32 %v1876_v55, 0.0  ;;  %1891 = vst [vmem:[%s3399_s14] sm:$0xff] %v1883_v12  ;;  %v1877_v15 = vadd.f32 %v1865_v34, %v1843_v0 }
 0x7a7   : > { %v1848_v37 = vpop.f32.mrf.mxu0 }
 0x7a8   : > { %1892 = vst [vmem:[%s3399_s14 + $0x8] sm:$0xff] %v1884_v45  ;;  %v1849_v25 = vadd.f32 %v1848_v37, %v1747_v39  ;;  %v1878_v16 = vadd.f32 %v1865_v34, %v1845_v36  ;;  %v1885_v52 = vmax.f32 %v1877_v15, 0.0 }
 0x7a9   : > { %v1850_v19 = vpop.f32.mrf.mxu0 }
 0x7aa   : > { %v1851_v18 = vadd.f32 %v1850_v19, %v1749_v14  ;;  %v1879_v20 = vadd.f32 %v1869_v46, %v1849_v25  ;;  %v1886_v47 = vmax.f32 %v1878_v16, 0.0  ;;  %1893 = vst [vmem:[%s3399_s14 + $0x10] sm:$0xff] %v1885_v52 }
 0x7ab   : > { %v1854_v50 = vpop.f32.mrf.mxu0 }
 0x7ac   : > { %v1880_v22 = vadd.f32 %v1869_v46, %v1851_v18  ;;  %v1887_v29 = vmax.f32 %v1879_v20, 0.0  ;;  %v1855_v23 = vadd.f32 %v1854_v50, %v1753_v51  ;;  %1894 = vst [vmem:[%s3399_s14 + $0x18] sm:$0xff] %v1886_v47 }
 0x7ad   : > { %v1856_v40 = vpop.f32.mrf.mxu0 }
 0x7ae   : > { %v1888_v41 = vmax.f32 %v1880_v22, 0.0  ;;  %1895 = vst [vmem:[%s3399_s14 + $0x20] sm:$0xff] %v1887_v29  ;;  %v1857_v1 = vadd.f32 %v1856_v40, %v1755_v38  ;;  %v1881_v8 = vadd.f32 %v1873_v24, %v1855_v23 }
 0x7b0   : > { %1896 = vst [vmem:[%s3399_s14 + $0x28] sm:$0xff] %v1888_v41  ;;  %v1882_v31 = vadd.f32 %v1873_v24, %v1857_v1  ;;  %v1889_v30 = vmax.f32 %v1881_v8, 0.0 }
 0x7b2   : > { %v1890_v63 = vmax.f32 %v1882_v31, 0.0  ;;  %1897 = vst [vmem:[%s3399_s14 + $0x30] sm:$0xff] %v1889_v30 }
 0x7b4   : > { %1898 = vst [vmem:[%s3399_s14 + $0x38] sm:$0xff] %v1890_v63 }
 0x7b5   : > { %2439 = shalt.err (!%p2436_p7)
}
 0x7b6   : > { %s2440_s30 = scalar_lea.hbm %s3415_s12, 1024  ;;  %s2444_s24 = scalar_lea.hbm %s3472_s11, 2048 }
 0x7b7   : > { %p2441_p4 = scmp.ne.s32.totalorder %s3415_s12, %s2440_s30  ;;  %p2445_p10 = scmp.lt.s32.totalorder %s3415_s12, %s3472_s11 }
 0x7b8   : > { %p2446_p8 = scmp.lt.s32.totalorder %s2444_s24, %s2440_s30 }
 0x7b9   : > { %p2442_p9 = pnand %p2441_p4, %p2631_p5 }
 0x7ba   : > { %p2447_p6 = por %p2446_p8, %p2445_p10 }
 0x7bb   : > { %p2443_p12 = pneg %p2442_p9 }
 0x7bd   : > { %p2448_p11 = pnand %p2447_p6, %p2443_p12 }
 0x7bf   : > { %2451 = shalt.err (!%p2448_p11)
}
 0x7c0   : > { %s2532_s21 = smov 256  }
 0x7c1   : > { %2126 = dma.vmem_to_hbm [thread:$0]  (%p2631_p5), %s3409_s29, 1024, %s3415_s12, %s3420_s16, %s2532_s21, %s2532_s21, %s2522_s13  }
 0x7c2 PF: > { %p2168_p0 = scmp.ge.s32.totalorder %s2502_s20, 2  ;;  %s1928_s15 = sand.u32 1, %s2490_s17  }
 0x7c3   : > { %p3500_p3 = scmp.ne.s32.totalorder %s3485_s28, 0  ;;  %s1929_s26 = scalar_lea.sflag [#allocation5], %s1928_s15 }
 0x7c5   : > { %p2151_p1 = pnand %p2168_p0, %p3500_p3 }
 0x7c7   : > { %p2152_p13 = pneg %p2151_p1 }
 0x7c9   : > { %2485 = dma.done.wait (%p2152_p13), %s1929_s26, 1024  }
 0x7ca   : > { %2487 = vsyncadd (%p2152_p13), %s1929_s26, 4294966272  ;;  %s3501_s20 = sld [smem:[#allocation22_spill]]  ;;  %s3504_s17 = smov %s2494_s18 }
 0x7cb   : > { %s3502_s27 = sld [smem:[#allocation21_spill]] }
 0x7cc   : > { %s3503_s19 = sld [smem:[#allocation23_spill]] }
 0x7d0   : > { %p25_p2 = scmp.ge.s32.totalorder %s3501_s20, 4  }
 0x7d1   : > { %s3505_s18 = smov %s3502_s27 }
 0x7d2   :  { %27 = sbr.rel (!%p25_p2) target bundleno = 7 (0x7), region = 128 }
 0x7d7   :  { %1934 = vsyncpa [#allocation4], 1 }
 0x7d8   :  { %1936 = vsyncpa [#allocation4 + $0x1], 1 }
 0x7d9   :  { %1937 = vsyncpa [#allocation7], 1 }
 0x7da   :  { %1938 = vsyncpa [#allocation10], 1 }
 0x7db   :  { %1939 = vsyncpa [#allocation13], 1 }
 0x7dc   :  { %1940 = vsyncpa [#allocation5], 1 }
 0x7dd   :  { %1942 = vsyncpa [#allocation5 + $0x1], 1 }

</bundles_post_ra>
